<compile_context>
chip_gen: v7x
topology: tpu7x:2x2x1
jax: 0.10.0
libtpu: 0.0.40
codegen_flags: <defaults>
</compile_context>

<pallas_src>
import numpy as np
import jax
import jax.numpy as jnp
from jax.experimental import pallas as pl
from jax.experimental.pallas import tpu as pltpu


# -----------------------------------------------------------------------------
# Host-side glue: linear (degree=1) spline basis, identical to torch_spline_conv
# -----------------------------------------------------------------------------
def linear_spline_basis(pseudo, kernel_size, is_open_spline):
    """Degree-1 spline basis.  pseudo: [E, D] in [0,1).  Returns basis [E, S] f32,
    weight_index [E, S] i32 with S = 2**D, matching torch_spline_conv semantics."""
    pseudo = np.asarray(pseudo, dtype=np.float64)
    E, D = pseudo.shape
    S = 2 ** D
    basis = np.ones((E, S), dtype=np.float64)
    wi = np.zeros((E, S), dtype=np.int64)
    offset = 1
    for d in range(D):
        ks = int(kernel_size[d])
        v = pseudo[:, d] * (ks - 1 * int(is_open_spline[d]))  # degree = 1
        fl = np.floor(v)
        fr = v - fl
        for s in range(S):
            kmod = (s >> d) & 1                      # dim 0 is fastest-varying
            comp = fr if kmod == 1 else (1.0 - fr)
            basis[:, s] *= comp
            wi[:, s] += ((fl.astype(np.int64) + kmod) % ks) * offset
        offset *= ks
    return basis.astype(np.float32), wi.astype(np.int32)


def build_aggregation(row, col, basis, wi, N, K):
    """A[k, i, j] = (1/deg_i) * sum over edges e (row=i, col=j), slots s with wi==k of
    basis[e, s].  SplineConv aggregation + norm is then  sum_k (A[k] @ X) @ W[k]."""
    A = np.zeros((K, N, N), dtype=np.float32)
    for s in range(basis.shape[1]):
        np.add.at(A, (wi[:, s], row, col), basis[:, s])
    deg = np.zeros((N,), dtype=np.float32)
    np.add.at(deg, row, 1.0)
    A *= (1.0 / np.clip(deg, 1.0, None)).astype(np.float32)[None, :, None]
    return A


def tile_aggregation(A, tile_n):
    """[K, N, N] -> [N//tile_n, K*tile_n, N]: rows of node-tile t are stacked over k, so
    each grid step's stage-1 aggregation is a single tall MXU matmul."""
    K, N, _ = A.shape
    nt = N // tile_n
    A_t = A.reshape(K, nt, tile_n, N).transpose(1, 0, 2, 3).reshape(nt, K * tile_n, N)
    return np.ascontiguousarray(A_t)


def _vmem_limit_bytes(default=48 * 1024 * 1024):
    """Per-generation VMEM budget: ~85% of physical (~108 MiB v5e/v6e, ~54 MiB v7x)."""
    try:
        cap = int(pltpu.get_tpu_info().vmem_capacity_bytes)
        if cap > 0:
            return int(cap * 0.85)
    except Exception:
        pass
    return default


# -----------------------------------------------------------------------------
# Pallas kernel: fused GCLSTM cell forward
#   grid = (node-row tiles [parallel], column blocks of the contraction axis N [arbitrary])
# -----------------------------------------------------------------------------
def gclstm_kernel(a_ref, xhc_ref, xhr_ref, c_ref, wxh_ref, rxh_ref, b_ref,
                  h_ref, c_out_ref, acc_ref):
    j = pl.program_id(1)
    tile = c_ref.shape[0]          # node rows in this tile
    Hd = c_ref.shape[1]            # hidden dim
    K = wxh_ref.shape[0]           # spline kernel bins

    @pl.when(j == 0)
    def _():
        acc_ref[...] = jnp.zeros_like(acc_ref)

    # Stage 1 (partial over this column block): one tall bf16 MXU matmul, f32 accumulation
    # into a VMEM scratch that persists across the column (reduction) axis.
    acc_ref[...] += jnp.dot(a_ref[0], xhc_ref[...], preferred_element_type=jnp.float32)

    @pl.when(j == pl.num_programs(1) - 1)
    def _():
        # Stage 2 entirely in f32 (no bf16 re-round of the aggregated intermediate).
        pre = jnp.dot(xhr_ref[...], rxh_ref[...], preferred_element_type=jnp.float32)
        pre = pre + b_ref[...]
        # K is small & static -> unrolled; with production tile_n (128/256) each sliver
        # matmul fills the MXU rows, capturing most of the fused-K-contraction win.
        for k in range(K):
            pre = pre + jnp.dot(acc_ref[k * tile:(k + 1) * tile, :], wxh_ref[k],
                                preferred_element_type=jnp.float32)

        i_g = jax.nn.sigmoid(pre[:, 0 * Hd:1 * Hd])
        f_g = jax.nn.sigmoid(pre[:, 1 * Hd:2 * Hd])
        g_g = jnp.tanh(pre[:, 2 * Hd:3 * Hd])
        o_g = jax.nn.sigmoid(pre[:, 3 * Hd:4 * Hd])

        c_new = f_g * c_ref[...] + i_g * g_g
        h_new = o_g * jnp.tanh(c_new)
        h_ref[...] = h_new.astype(h_ref.dtype)
        c_out_ref[...] = c_new.astype(c_out_ref.dtype)


def gclstm_forward(A_tiled, x, h, c, Wxh, Rxh, b, *, tile_n, col_n=None):
    """A_tiled: [N//tile_n, K*tile_n, N] bf16 (deg folded, pre-cast ONCE per graph).
    col_n: column block of the contraction axis N (must equal N or be a multiple of 128);
    bounds the A / xh VMEM footprint independent of graph size.  Returns (h_new, c_new)."""
    N, Cin = x.shape
    Hd = h.shape[1]
    K, C, G4 = Wxh.shape
    if col_n is None:
        col_n = N
    nt = N // tile_n
    ncol = N // col_n
    assert N % tile_n == 0 and tile_n % 8 == 0
    assert N % col_n == 0 and (col_n == N or col_n % 128 == 0)
    assert A_tiled.shape == (nt, K * tile_n, N) and A_tiled.dtype == jnp.bfloat16
    assert C == Cin + Hd and G4 == 4 * Hd

    xh = jnp.concatenate([x, h], axis=-1).astype(jnp.float32)   # [N, Cin+H] (small)
    xh_bf = xh.astype(jnp.bfloat16)                             # stage-1 MXU operand

    h_new, c_new = pl.pallas_call(
        gclstm_kernel,
        out_shape=(jax.ShapeDtypeStruct((N, Hd), jnp.float32),
                   jax.ShapeDtypeStruct((N, Hd), jnp.float32)),
        grid=(nt, ncol),
        in_specs=[
            pl.BlockSpec((1, K * tile_n, col_n), lambda i, j: (i, 0, j)),  # A row tile, col-blocked
            pl.BlockSpec((col_n, C), lambda i, j: (j, 0)),                 # xh column block (bf16)
            pl.BlockSpec((tile_n, C), lambda i, j: (i, 0)),                # xh row tile (f32 root/self)
            pl.BlockSpec((tile_n, Hd), lambda i, j: (i, 0)),               # c row tile
            pl.BlockSpec((K, C, G4), lambda i, j: (0, 0, 0)),              # Wxh (resident)
            pl.BlockSpec((C, G4), lambda i, j: (0, 0)),                    # Rxh (resident)
            pl.BlockSpec((1, G4), lambda i, j: (0, 0)),                    # bias (resident)
        ],
        out_specs=(pl.BlockSpec((tile_n, Hd), lambda i, j: (i, 0)),
                   pl.BlockSpec((tile_n, Hd), lambda i, j: (i, 0))),
        scratch_shapes=[pltpu.VMEM((K * tile_n, C), jnp.float32)],
        compiler_params=pltpu.CompilerParams(
            dimension_semantics=("parallel", "arbitrary"),   # rows across TCs, cols reduced
            vmem_limit_bytes=_vmem_limit_bytes(),
        ),
    )(A_tiled, xh_bf, xh, c.astype(jnp.float32),
      Wxh.astype(jnp.float32), Rxh.astype(jnp.float32), b.astype(jnp.float32))
    return h_new, c_new


# -----------------------------------------------------------------------------
# Pure numpy references
# -----------------------------------------------------------------------------
def spline_ref(x, row, col, basis, wi, W, root, bias, N):
    """Edge-based reference mirroring the PyTorch Spline forward."""
    xe = x[col]
    We = W[wi]                                    # [E, S, Cin, Cout]
    out_e = np.einsum('ec,esco,es->eo', xe, We, basis)
    out = np.zeros((N, W.shape[-1]), dtype=np.float64)
    np.add.at(out, row, out_e)
    deg = np.zeros((N,), dtype=np.float64)
    np.add.at(deg, row, 1.0)
    out = out / np.clip(deg, 1.0, None)[:, None]
    out = out + x @ root + bias
    return out


def gclstm_ref(x, h, c, row, col, basis, wi, params, N):
    def sigmoid(z):
        return 1.0 / (1.0 + np.exp(-z))
    pre = {}
    for gate in ('i', 'f', 'g', 'o'):
        px = spline_ref(x, row, col, basis, wi, *params['x' + gate], N)
        ph = spline_ref(h, row, col, basis, wi, *params['h' + gate], N)
        pre[gate] = px + ph
    i = sigmoid(pre['i']); f = sigmoid(pre['f'])
    g = np.tanh(pre['g']); o = sigmoid(pre['o'])
    c_new = f * c + i * g
    h_new = o * np.tanh(c_new)
    return h_new, c_new


def gclstm_dense_ref(A_scaled, xh, c, Wxh, Rxh, b):
    """Dense fused reformulation (same math as the kernel) in numpy f64."""
    pre = xh @ Rxh + b
    for k in range(A_scaled.shape[0]):
        pre = pre + (A_scaled[k] @ xh) @ Wxh[k]
    Hd = c.shape[1]
    sig = lambda z: 1.0 / (1.0 + np.exp(-z))
    i = sig(pre[:, :Hd]); f = sig(pre[:, Hd:2 * Hd])
    g = np.tanh(pre[:, 2 * Hd:3 * Hd]); o = sig(pre[:, 3 * Hd:])
    c_new = f * c + i * g
    h_new = o * np.tanh(c_new)
    return h_new, c_new


# -----------------------------------------------------------------------------
# Test harness
# -----------------------------------------------------------------------------
def _init_params(keys_iter, input_dim, hidden_dim, K):
    """One Spline per gate/input as in the PyTorch module; uniform(-b, b), b=1/sqrt(Cin*K)."""
    params = {}
    for name, cin in (('xi', input_dim), ('hi', hidden_dim),
                      ('xf', input_dim), ('hf', hidden_dim),
                      ('xg', input_dim), ('hg', hidden_dim),
                      ('xo', input_dim), ('ho', hidden_dim)):
        bound = 1.0 / np.sqrt(cin * K)
        W = np.asarray(jax.random.uniform(next(keys_iter), (K, cin, hidden_dim),
                                          jnp.float32, -bound, bound))
        R = np.asarray(jax.random.uniform(next(keys_iter), (cin, hidden_dim),
                                          jnp.float32, -bound, bound))
        bvec = np.asarray(jax.random.uniform(next(keys_iter), (hidden_dim,),
                                             jnp.float32, -bound, bound))
        params[name] = (W, R, bvec)
    return params


def _fuse_params(params):
    """Fuse x/h paths and all four gates (order i, f, g, o along the out dim)."""
    Wx = np.concatenate([params['x' + g][0] for g in 'ifgo'], axis=-1)   # [K, Cin, 4H]
    Wh = np.concatenate([params['h' + g][0] for g in 'ifgo'], axis=-1)   # [K, H,   4H]
    Wxh = np.concatenate([Wx, Wh], axis=1)                               # [K, Cin+H, 4H]
    Rx = np.concatenate([params['x' + g][1] for g in 'ifgo'], axis=-1)
    Rh = np.concatenate([params['h' + g][1] for g in 'ifgo'], axis=-1)
    Rxh = np.concatenate([Rx, Rh], axis=0)                               # [Cin+H, 4H]
    b = np.concatenate([params['x' + g][2] + params['h' + g][2] for g in 'ifgo'],
                       axis=-1)[None, :]                                 # [1, 4H]
    return Wxh, Rxh, b


def _run_case(key, *, N, input_dim, hidden_dim, dim, kernel_size, E, tile_n, col_n):
    K = kernel_size ** dim
    keys = iter(jax.random.split(key, 40))
    x = np.asarray(jax.random.normal(next(keys), (N, input_dim), jnp.float32))
    h = np.asarray(jax.random.normal(next(keys), (N, hidden_dim), jnp.float32))
    c = np.asarray(jax.random.normal(next(keys), (N, hidden_dim), jnp.float32))
    row = np.asarray(jax.random.randint(next(keys), (E,), 0, N, jnp.int32))
    col = np.asarray(jax.random.randint(next(keys), (E,), 0, N, jnp.int32))
    edge_attr = np.asarray(jax.random.uniform(next(keys), (E, dim), jnp.float32))
    params = _init_params(keys, input_dim, hidden_dim, K)
    Wxh, Rxh, b = _fuse_params(params)

    # Host glue (once per graph): basis + dense per-bin aggregation + row tiling + bf16 cast.
    basis, wi = linear_spline_basis(edge_attr, [kernel_size] * dim, [True] * dim)
    A = build_aggregation(row, col, basis, wi, N, K)          # [K, N, N]
    A_tiled = tile_aggregation(A, tile_n)                     # [N//tile, K*tile, N]
    A_tiled_bf = jnp.asarray(A_tiled, dtype=jnp.bfloat16)     # pre-cast ONCE per graph

    h_new, c_new = gclstm_forward(A_tiled_bf, jnp.asarray(x), jnp.asarray(h),
                                  jnp.asarray(c), jnp.asarray(Wxh), jnp.asarray(Rxh),
                                  jnp.asarray(b), tile_n=tile_n, col_n=col_n)
    h_new, c_new = jax.block_until_ready((h_new, c_new))
    h_new = np.asarray(h_new); c_new = np.asarray(c_new)

    # (1) Dense fused reformulation (f64) vs edge-based PyTorch-semantics reference (f64).
    xh64 = np.concatenate([x, h], axis=-1).astype(np.float64)
    h_dense, c_dense = gclstm_dense_ref(A.astype(np.float64), xh64, c.astype(np.float64),
                                        Wxh.astype(np.float64), Rxh.astype(np.float64),
                                        b.astype(np.float64))
    h_edge, c_edge = gclstm_ref(x.astype(np.float64), h.astype(np.float64),
                                c.astype(np.float64), row, col,
                                basis.astype(np.float64), wi, params, N)
    np.testing.assert_allclose(h_dense, h_edge, rtol=1e-4, atol=1e-4)
    np.testing.assert_allclose(c_dense, c_edge, rtol=1e-4, atol=1e-4)

    # (2) Pallas kernel (bf16 A / xh stage-1, f32 accumulation + f32 stage-2) vs dense ref.
    np.testing.assert_allclose(h_new, h_dense, rtol=5e-2, atol=5e-2)
    np.testing.assert_allclose(c_new, c_dense, rtol=5e-2, atol=5e-2)


if __name__ == "__main__":
    key = jax.random.PRNGKey(0)
    k1, k2 = jax.random.split(key, 2)

    # Case 1: module-consistent small shapes (batch=2, graph_size=32 -> N=64 nodes).
    _run_case(k1, N=64, input_dim=8, hidden_dim=32, dim=2, kernel_size=3,
              E=256, tile_n=32, col_n=64)

    # Case 2: exercises the column-blocked (reduction-axis) accumulation path.
    _run_case(k2, N=256, input_dim=8, hidden_dim=32, dim=2, kernel_size=3,
              E=1024, tile_n=64, col_n=128)

    print("KERNEL_OK")
</pallas_src>

<mosaic_0001>
module attributes {stable_mosaic.version = 11 : i64} {
  func.func @gclstm_kernel(%arg0: i32, %arg1: i32, %arg2: memref<1x288x64xbf16, #tpu.memory_space<vmem>>, %arg3: memref<64x40xbf16, #tpu.memory_space<vmem>>, %arg4: memref<32x40xf32, #tpu.memory_space<vmem>>, %arg5: memref<32x32xf32, #tpu.memory_space<vmem>>, %arg6: memref<9x40x128xf32, #tpu.memory_space<vmem>>, %arg7: memref<40x128xf32, #tpu.memory_space<vmem>>, %arg8: memref<1x128xf32, #tpu.memory_space<vmem>>, %arg9: memref<32x32xf32, #tpu.memory_space<vmem>>, %arg10: memref<32x32xf32, #tpu.memory_space<vmem>>, %arg11: memref<288x40xf32, #tpu.memory_space<vmem>>) attributes {dimension_semantics = [#tpu.dimension_semantics<parallel>, #tpu.dimension_semantics<arbitrary>], iteration_bounds = array<i64: 2, 1>, scalar_prefetch = 0 : i64, scratch_operands = 1 : i64, tpu.core_type = #tpu.core_type<tc>, window_params = [{transform_indices = @transform_0, window_bounds = array<i64: 1, 288, 64>}, {transform_indices = @transform_1, window_bounds = array<i64: 64, 40>}, {transform_indices = @transform_2, window_bounds = array<i64: 32, 40>}, {transform_indices = @transform_3, window_bounds = array<i64: 32, 32>}, {pipeline_mode = #tpu.pipeline_mode<synchronous>, transform_indices = @transform_4, window_bounds = array<i64: 9, 40, 128>}, {pipeline_mode = #tpu.pipeline_mode<synchronous>, transform_indices = @transform_5, window_bounds = array<i64: 40, 128>}, {pipeline_mode = #tpu.pipeline_mode<synchronous>, transform_indices = @transform_6, window_bounds = array<i64: 1, 128>}, {transform_indices = @transform_7, window_bounds = array<i64: 32, 32>}, {transform_indices = @transform_8, window_bounds = array<i64: 32, 32>}]} {
    %c0_i32 = arith.constant 0 : i32
    %0 = arith.cmpi eq, %arg1, %c0_i32 : i32
    %1 = arith.extui %0 : i1 to i32
    %c0_i32_0 = arith.constant 0 : i32
    %2 = arith.cmpi ne, %1, %c0_i32_0 : i32
    scf.if %2 {
      %cst_11 = arith.constant 0.000000e+00 : f32
      %13 = vector.broadcast %cst_11 : f32 to vector<288x40xf32>
      %c0_12 = arith.constant 0 : index
      %c0_13 = arith.constant 0 : index
      %14 = vector.load %arg11[%c0_12, %c0_13] : memref<288x40xf32, #tpu.memory_space<vmem>>, vector<288x40xf32>
      tpu.vector_store %arg11[%c0_12, %c0_13], %13 {strides = array<i32>} : memref<288x40xf32, #tpu.memory_space<vmem>>, vector<288x40xf32>,
    } else {
    }
    %c0 = arith.constant 0 : index
    %c0_1 = arith.constant 0 : index
    %3 = vector.load %arg11[%c0, %c0_1] : memref<288x40xf32, #tpu.memory_space<vmem>>, vector<288x40xf32>
    %c0_2 = arith.constant 0 : index
    %c0_3 = arith.constant 0 : index
    %c0_4 = arith.constant 0 : index
    %4 = vector.load %arg2[%c0_2, %c0_3, %c0_4] : memref<1x288x64xbf16, #tpu.memory_space<vmem>>, vector<1x288x64xbf16>
    %5 = vector.shape_cast %4 : vector<1x288x64xbf16> to vector<288x64xbf16>
    %c0_5 = arith.constant 0 : index
    %c0_6 = arith.constant 0 : index
    %6 = vector.load %arg3[%c0_5, %c0_6] : memref<64x40xbf16, #tpu.memory_space<vmem>>, vector<64x40xbf16>
    %cst = arith.constant dense<0.000000e+00> : vector<288x40xf32>
    %7 = tpu.matmul %5, %6, %cst {dimension_numbers = #tpu.dot_dimension_numbers<[1], [0], [0], [1], [0, 0, 1, 1], [], []>} : vector<288x64xbf16>, vector<64x40xbf16>, vector<288x40xf32> -> vector<288x40xf32>
    %8 = arith.addf %3, %7 : vector<288x40xf32>
    %c0_7 = arith.constant 0 : index
    %c0_8 = arith.constant 0 : index
    %9 = vector.load %arg11[%c0_7, %c0_8] : memref<288x40xf32, #tpu.memory_space<vmem>>, vector<288x40xf32>
    tpu.vector_store %arg11[%c0_7, %c0_8], %8 {strides = array<i32>} : memref<288x40xf32, #tpu.memory_space<vmem>>, vector<288x40xf32>,
    %c0_i32_9 = arith.constant 0 : i32
    %10 = arith.cmpi eq, %arg1, %c0_i32_9 : i32
    %11 = arith.extui %10 : i1 to i32
    %c0_i32_10 = arith.constant 0 : i32
    %12 = arith.cmpi ne, %11, %c0_i32_10 : i32
    scf.if %12 {
      %c0_11 = arith.constant 0 : index
      %c0_12 = arith.constant 0 : index
      %13 = vector.load %arg4[%c0_11, %c0_12] : memref<32x40xf32, #tpu.memory_space<vmem>>, vector<32x40xf32>
      %c0_13 = arith.constant 0 : index
      %c0_14 = arith.constant 0 : index
      %14 = vector.load %arg7[%c0_13, %c0_14] : memref<40x128xf32, #tpu.memory_space<vmem>>, vector<40x128xf32>
      %cst_15 = arith.constant dense<0.000000e+00> : vector<32x128xf32>
      %15 = tpu.matmul %13, %14, %cst_15 {dimension_numbers = #tpu.dot_dimension_numbers<[1], [0], [0], [1], [0, 0, 1, 1], [], []>} : vector<32x40xf32>, vector<40x128xf32>, vector<32x128xf32> -> vector<32x128xf32>
      %c0_16 = arith.constant 0 : index
      %c0_17 = arith.constant 0 : index
      %16 = vector.load %arg8[%c0_16, %c0_17] : memref<1x128xf32, #tpu.memory_space<vmem>>, vector<1x128xf32>
      %17 = vector.broadcast %16 : vector<1x128xf32> to vector<32x128xf32>
      %18 = arith.addf %15, %17 : vector<32x128xf32>
      %c0_18 = arith.constant 0 : index
      %c0_19 = arith.constant 0 : index
      %19 = vector.load %arg11[%c0_18, %c0_19] : memref<288x40xf32, #tpu.memory_space<vmem>>, vector<32x40xf32>
      %c0_20 = arith.constant 0 : index
      %c0_21 = arith.constant 0 : index
      %c0_22 = arith.constant 0 : index
      %20 = vector.load %arg6[%c0_20, %c0_21, %c0_22] : memref<9x40x128xf32, #tpu.memory_space<vmem>>, vector<1x40x128xf32>
      %21 = vector.shape_cast %20 : vector<1x40x128xf32> to vector<40x128xf32>
      %cst_23 = arith.constant dense<0.000000e+00> : vector<32x128xf32>
      %22 = tpu.matmul %19, %21, %cst_23 {dimension_numbers = #tpu.dot_dimension_numbers<[1], [0], [0], [1], [0, 0, 1, 1], [], []>} : vector<32x40xf32>, vector<40x128xf32>, vector<32x128xf32> -> vector<32x128xf32>
      %23 = arith.addf %18, %22 : vector<32x128xf32>
      %c32 = arith.constant 32 : index
      %c0_24 = arith.constant 0 : index
      %24 = vector.load %arg11[%c32, %c0_24] : memref<288x40xf32, #tpu.memory_space<vmem>>, vector<32x40xf32>
      %c1 = arith.constant 1 : index
      %c0_25 = arith.constant 0 : index
      %c0_26 = arith.constant 0 : index
      %25 = vector.load %arg6[%c1, %c0_25, %c0_26] : memref<9x40x128xf32, #tpu.memory_space<vmem>>, vector<1x40x128xf32>
      %26 = vector.shape_cast %25 : vector<1x40x128xf32> to vector<40x128xf32>
      %cst_27 = arith.constant dense<0.000000e+00> : vector<32x128xf32>
      %27 = tpu.matmul %24, %26, %cst_27 {dimension_numbers = #tpu.dot_dimension_numbers<[1], [0], [0], [1], [0, 0, 1, 1], [], []>} : vector<32x40xf32>, vector<40x128xf32>, vector<32x128xf32> -> vector<32x128xf32>
      %28 = arith.addf %23, %27 : vector<32x128xf32>
      %c64 = arith.constant 64 : index
      %c0_28 = arith.constant 0 : index
      %29 = vector.load %arg11[%c64, %c0_28] : memref<288x40xf32, #tpu.memory_space<vmem>>, vector<32x40xf32>
      %c2 = arith.constant 2 : index
      %c0_29 = arith.constant 0 : index
      %c0_30 = arith.constant 0 : index
      %30 = vector.load %arg6[%c2, %c0_29, %c0_30] : memref<9x40x128xf32, #tpu.memory_space<vmem>>, vector<1x40x128xf32>
      %31 = vector.shape_cast %30 : vector<1x40x128xf32> to vector<40x128xf32>
      %cst_31 = arith.constant dense<0.000000e+00> : vector<32x128xf32>
      %32 = tpu.matmul %29, %31, %cst_31 {dimension_numbers = #tpu.dot_dimension_numbers<[1], [0], [0], [1], [0, 0, 1, 1], [], []>} : vector<32x40xf32>, vector<40x128xf32>, vector<32x128xf32> -> vector<32x128xf32>
      %33 = arith.addf %28, %32 : vector<32x128xf32>
      %c96 = arith.constant 96 : index
      %c0_32 = arith.constant 0 : index
      %34 = vector.load %arg11[%c96, %c0_32] : memref<288x40xf32, #tpu.memory_space<vmem>>, vector<32x40xf32>
      %c3 = arith.constant 3 : index
      %c0_33 = arith.constant 0 : index
      %c0_34 = arith.constant 0 : index
      %35 = vector.load %arg6[%c3, %c0_33, %c0_34] : memref<9x40x128xf32, #tpu.memory_space<vmem>>, vector<1x40x128xf32>
      %36 = vector.shape_cast %35 : vector<1x40x128xf32> to vector<40x128xf32>
      %cst_35 = arith.constant dense<0.000000e+00> : vector<32x128xf32>
      %37 = tpu.matmul %34, %36, %cst_35 {dimension_numbers = #tpu.dot_dimension_numbers<[1], [0], [0], [1], [0, 0, 1, 1], [], []>} : vector<32x40xf32>, vector<40x128xf32>, vector<32x128xf32> -> vector<32x128xf32>
      %38 = arith.addf %33, %37 : vector<32x128xf32>
      %c128 = arith.constant 128 : index
      %c0_36 = arith.constant 0 : index
      %39 = vector.load %arg11[%c128, %c0_36] : memref<288x40xf32, #tpu.memory_space<vmem>>, vector<32x40xf32>
      %c4 = arith.constant 4 : index
      %c0_37 = arith.constant 0 : index
      %c0_38 = arith.constant 0 : index
      %40 = vector.load %arg6[%c4, %c0_37, %c0_38] : memref<9x40x128xf32, #tpu.memory_space<vmem>>, vector<1x40x128xf32>
      %41 = vector.shape_cast %40 : vector<1x40x128xf32> to vector<40x128xf32>
      %cst_39 = arith.constant dense<0.000000e+00> : vector<32x128xf32>
      %42 = tpu.matmul %39, %41, %cst_39 {dimension_numbers = #tpu.dot_dimension_numbers<[1], [0], [0], [1], [0, 0, 1, 1], [], []>} : vector<32x40xf32>, vector<40x128xf32>, vector<32x128xf32> -> vector<32x128xf32>
      %43 = arith.addf %38, %42 : vector<32x128xf32>
      %c160 = arith.constant 160 : index
      %c0_40 = arith.constant 0 : index
      %44 = vector.load %arg11[%c160, %c0_40] : memref<288x40xf32, #tpu.memory_space<vmem>>, vector<32x40xf32>
      %c5 = arith.constant 5 : index
      %c0_41 = arith.constant 0 : index
      %c0_42 = arith.constant 0 : index
      %45 = vector.load %arg6[%c5, %c0_41, %c0_42] : memref<9x40x128xf32, #tpu.memory_space<vmem>>, vector<1x40x128xf32>
      %46 = vector.shape_cast %45 : vector<1x40x128xf32> to vector<40x128xf32>
      %cst_43 = arith.constant dense<0.000000e+00> : vector<32x128xf32>
      %47 = tpu.matmul %44, %46, %cst_43 {dimension_numbers = #tpu.dot_dimension_numbers<[1], [0], [0], [1], [0, 0, 1, 1], [], []>} : vector<32x40xf32>, vector<40x128xf32>, vector<32x128xf32> -> vector<32x128xf32>
      %48 = arith.addf %43, %47 : vector<32x128xf32>
      %c192 = arith.constant 192 : index
      %c0_44 = arith.constant 0 : index
      %49 = vector.load %arg11[%c192, %c0_44] : memref<288x40xf32, #tpu.memory_space<vmem>>, vector<32x40xf32>
      %c6 = arith.constant 6 : index
      %c0_45 = arith.constant 0 : index
      %c0_46 = arith.constant 0 : index
      %50 = vector.load %arg6[%c6, %c0_45, %c0_46] : memref<9x40x128xf32, #tpu.memory_space<vmem>>, vector<1x40x128xf32>
      %51 = vector.shape_cast %50 : vector<1x40x128xf32> to vector<40x128xf32>
      %cst_47 = arith.constant dense<0.000000e+00> : vector<32x128xf32>
      %52 = tpu.matmul %49, %51, %cst_47 {dimension_numbers = #tpu.dot_dimension_numbers<[1], [0], [0], [1], [0, 0, 1, 1], [], []>} : vector<32x40xf32>, vector<40x128xf32>, vector<32x128xf32> -> vector<32x128xf32>
      %53 = arith.addf %48, %52 : vector<32x128xf32>
      %c224 = arith.constant 224 : index
      %c0_48 = arith.constant 0 : index
      %54 = vector.load %arg11[%c224, %c0_48] : memref<288x40xf32, #tpu.memory_space<vmem>>, vector<32x40xf32>
      %c7 = arith.constant 7 : index
      %c0_49 = arith.constant 0 : index
      %c0_50 = arith.constant 0 : index
      %55 = vector.load %arg6[%c7, %c0_49, %c0_50] : memref<9x40x128xf32, #tpu.memory_space<vmem>>, vector<1x40x128xf32>
      %56 = vector.shape_cast %55 : vector<1x40x128xf32> to vector<40x128xf32>
      %cst_51 = arith.constant dense<0.000000e+00> : vector<32x128xf32>
      %57 = tpu.matmul %54, %56, %cst_51 {dimension_numbers = #tpu.dot_dimension_numbers<[1], [0], [0], [1], [0, 0, 1, 1], [], []>} : vector<32x40xf32>, vector<40x128xf32>, vector<32x128xf32> -> vector<32x128xf32>
      %58 = arith.addf %53, %57 : vector<32x128xf32>
      %c256 = arith.constant 256 : index
      %c0_52 = arith.constant 0 : index
      %59 = vector.load %arg11[%c256, %c0_52] : memref<288x40xf32, #tpu.memory_space<vmem>>, vector<32x40xf32>
      %c8 = arith.constant 8 : index
      %c0_53 = arith.constant 0 : index
      %c0_54 = arith.constant 0 : index
      %60 = vector.load %arg6[%c8, %c0_53, %c0_54] : memref<9x40x128xf32, #tpu.memory_space<vmem>>, vector<1x40x128xf32>
      %61 = vector.shape_cast %60 : vector<1x40x128xf32> to vector<40x128xf32>
      %cst_55 = arith.constant dense<0.000000e+00> : vector<32x128xf32>
      %62 = tpu.matmul %59, %61, %cst_55 {dimension_numbers = #tpu.dot_dimension_numbers<[1], [0], [0], [1], [0, 0, 1, 1], [], []>} : vector<32x40xf32>, vector<40x128xf32>, vector<32x128xf32> -> vector<32x128xf32>
      %63 = arith.addf %58, %62 : vector<32x128xf32>
      %64 = vector.extract_strided_slice %63 {offsets = [0, 0], sizes = [32, 32], strides = [1, 1]} : vector<32x128xf32> to vector<32x32xf32>
      %65 = arith.negf %64 : vector<32x32xf32>
      %66 = math.exp %65 : vector<32x32xf32>
      %cst_56 = arith.constant 1.000000e+00 : f32
      %67 = vector.broadcast %cst_56 : f32 to vector<32x32xf32>
      %68 = arith.addf %67, %66 : vector<32x32xf32>
      %69 = arith.divf %67, %68 : vector<32x32xf32>
      %70 = vector.extract_strided_slice %63 {offsets = [0, 32], sizes = [32, 32], strides = [1, 1]} : vector<32x128xf32> to vector<32x32xf32>
      %71 = arith.negf %70 : vector<32x32xf32>
      %72 = math.exp %71 : vector<32x32xf32>
      %cst_57 = arith.constant 1.000000e+00 : f32
      %73 = vector.broadcast %cst_57 : f32 to vector<32x32xf32>
      %74 = arith.addf %73, %72 : vector<32x32xf32>
      %75 = arith.divf %73, %74 : vector<32x32xf32>
      %76 = vector.extract_strided_slice %63 {offsets = [0, 64], sizes = [32, 32], strides = [1, 1]} : vector<32x128xf32> to vector<32x32xf32>
      %77 = math.tanh %76 : vector<32x32xf32>
      %78 = vector.extract_strided_slice %63 {offsets = [0, 96], sizes = [32, 32], strides = [1, 1]} : vector<32x128xf32> to vector<32x32xf32>
      %79 = arith.negf %78 : vector<32x32xf32>
      %80 = math.exp %79 : vector<32x32xf32>
      %cst_58 = arith.constant 1.000000e+00 : f32
      %81 = vector.broadcast %cst_58 : f32 to vector<32x32xf32>
      %82 = arith.addf %81, %80 : vector<32x32xf32>
      %83 = arith.divf %81, %82 : vector<32x32xf32>
      %c0_59 = arith.constant 0 : index
      %c0_60 = arith.constant 0 : index
      %84 = vector.load %arg5[%c0_59, %c0_60] : memref<32x32xf32, #tpu.memory_space<vmem>>, vector<32x32xf32>
      %85 = arith.mulf %75, %84 : vector<32x32xf32>
      %86 = arith.mulf %69, %77 : vector<32x32xf32>
      %87 = arith.addf %85, %86 : vector<32x32xf32>
      %88 = math.tanh %87 : vector<32x32xf32>
      %89 = arith.mulf %83, %88 : vector<32x32xf32>
      %c0_61 = arith.constant 0 : index
      %c0_62 = arith.constant 0 : index
      %90 = vector.load %arg9[%c0_61, %c0_62] : memref<32x32xf32, #tpu.memory_space<vmem>>, vector<32x32xf32>
      tpu.vector_store %arg9[%c0_61, %c0_62], %89 {strides = array<i32>} : memref<32x32xf32, #tpu.memory_space<vmem>>, vector<32x32xf32>,
      %c0_63 = arith.constant 0 : index
      %c0_64 = arith.constant 0 : index
      %91 = vector.load %arg10[%c0_63, %c0_64] : memref<32x32xf32, #tpu.memory_space<vmem>>, vector<32x32xf32>
      tpu.vector_store %arg10[%c0_63, %c0_64], %87 {strides = array<i32>} : memref<32x32xf32, #tpu.memory_space<vmem>>, vector<32x32xf32>,
    } else {
    }
    return
  }
  func.func @transform_0(%arg0: i32, %arg1: i32) -> (i32, i32, i32) {
    %c0_i32 = arith.constant 0 : i32
    %c0_i32_0 = arith.constant 0 : i32
    return %arg0, %c0_i32, %arg1 : i32, i32, i32
  }
  func.func @transform_1(%arg0: i32, %arg1: i32) -> (i32, i32) {
    %c0_i32 = arith.constant 0 : i32
    %c0_i32_0 = arith.constant 0 : i32
    return %arg1, %c0_i32 : i32, i32
  }
  func.func @transform_2(%arg0: i32, %arg1: i32) -> (i32, i32) {
    %c0_i32 = arith.constant 0 : i32
    %c0_i32_0 = arith.constant 0 : i32
    return %arg0, %c0_i32 : i32, i32
  }
  func.func @transform_3(%arg0: i32, %arg1: i32) -> (i32, i32) {
    %c0_i32 = arith.constant 0 : i32
    %c0_i32_0 = arith.constant 0 : i32
    return %arg0, %c0_i32 : i32, i32
  }
  func.func @transform_4(%arg0: i32, %arg1: i32) -> (i32, i32, i32) {
    %c0_i32 = arith.constant 0 : i32
    %c0_i32_0 = arith.constant 0 : i32
    %c0_i32_1 = arith.constant 0 : i32
    %c0_i32_2 = arith.constant 0 : i32
    return %c0_i32, %c0_i32_0, %c0_i32_1 : i32, i32, i32
  }
  func.func @transform_5(%arg0: i32, %arg1: i32) -> (i32, i32) {
    %c0_i32 = arith.constant 0 : i32
    %c0_i32_0 = arith.constant 0 : i32
    %c0_i32_1 = arith.constant 0 : i32
    return %c0_i32, %c0_i32_0 : i32, i32
  }
  func.func @transform_6(%arg0: i32, %arg1: i32) -> (i32, i32) {
    %c0_i32 = arith.constant 0 : i32
    %c0_i32_0 = arith.constant 0 : i32
    %c0_i32_1 = arith.constant 0 : i32
    return %c0_i32, %c0_i32_0 : i32, i32
  }
  func.func @transform_7(%arg0: i32, %arg1: i32) -> (i32, i32) {
    %c0_i32 = arith.constant 0 : i32
    %c0_i32_0 = arith.constant 0 : i32
    return %arg0, %c0_i32 : i32, i32
  }
  func.func @transform_8(%arg0: i32, %arg1: i32) -> (i32, i32) {
    %c0_i32 = arith.constant 0 : i32
    %c0_i32_0 = arith.constant 0 : i32
    return %arg0, %c0_i32 : i32, i32
  }
}

</mosaic_0001>

<bundles_post_ra>
// kernel: tpu_custom_call.1
= control target key start
LH: loop header
LB: loop body
LE: loop exit
PB: predicated region body
PF: predicated region fallthrough
CT: control target
= control target key end

     0   :  { %s3100_s27 = smov 0   ;;  %s3102_s28 = smov 0   ;;  %s3505_s0 = inlined_call_operand.vmem [shape: bf16[2,288,64], index: 0, kind: input, shape index: {}]   ;;  %s3506_s1 = inlined_call_operand.vmem [shape: bf16[64,40], index: 1, kind: input, shape index: {}]   ;;  %s3507_s2 = inlined_call_operand.vmem [shape: f32[64,40], index: 2, kind: input, shape index: {}]   ;;  %s3508_s3 = inlined_call_operand.vmem [shape: f32[64,32], index: 3, kind: input, shape index: {}]   ;;  %s3509_s4 = inlined_call_operand.vmem [shape: f32[9,40,128], index: 4, kind: input, shape index: {}]   ;;  %s3510_s5 = inlined_call_operand.vmem [shape: f32[40,128], index: 5, kind: input, shape index: {}]   ;;  %s3511_s6 = inlined_call_operand.vmem [shape: f32[1,128], index: 6, kind: input, shape index: {}]   ;;  %s3512_s7 = inlined_call_operand.vmem [shape: f32[64,32], index: 7, kind: output, shape index: {0}]   ;;  %s3513_s8 = inlined_call_operand.vmem [shape: f32[64,32], index: 8, kind: output, shape index: {1}]  }
   0x1   :  { %s3104_s29 = smov 0  }
   0x2 LB: > { %s31_s30 = sadd.s32 1, %s3045_s28  ;;  %p2371_p0 = scmp.ge.s32.totalorder %s3049_s29, 1  ;;  %s3049_s29 = sphi %s3104_s29, %s19_s29   ;;  %s3045_s28 = sphi %s3102_s28, %s3515_s28   ;;  %s3041_s27 = sphi %s3100_s27, %s3514_s27  }
   0x3   : > { %p33_p1 = scmp.ge.s32.totalorder %s31_s30, 2  ;;  %p315_p2 = scmp.lt.s32.totalorder %s3049_s29, 3 }
   0x5   : > { %s3517_s30 = smov (%p33_p1, %s31_s30), 0  ;;  %p316_p3 = pnand %p2371_p0, %p315_p2 }
   0x6   : > { %v2973_v0 = vld [vmem:[%s3506_s1] sm:$0xff] (!%p316_p3)   ;;  %p372_p4 = scmp.lt.s32.totalorder (!%p316_p3), %s3041_s27, 1  ;;  %v2974_v1 = vld [vmem:[%s3506_s1 + $0x8] sm:$0xff] (!%p316_p3)   ;;  %vm415_vm0 = vcmask (!%p316_p3), 326656   ;;  %v2975_v2 = vld [vmem:[%s3506_s1 + $0x10] sm:$0xff] (!%p316_p3)   ;;  %v3051_v3 = vmov (!%p316_p3), 0.0  }
   0x7   : > { %319 = sbr.rel (%p316_p3) target bundleno = 1048 (0x418), region = 48  ;;  %2620 = vmatprep.subr.bf16.mxu0 (!%p316_p3), %v2973_v0  ;;  %418 = vst.msk [vmem:[#allocation2 + $0x10] sm:$0xff] (!%p316_p3), %vm415_vm0, %v3051_v3  ;;  %416 = vst.msk [vmem:[#allocation2] sm:$0xff] (!%p316_p3), %vm415_vm0, %v3051_v3  ;;  %vm646_vm1 = vcmask (!%p316_p3), 523264   ;;  %v2976_v5 = vld [vmem:[%s3506_s1 + $0x18] sm:$0xff] (!%p316_p3)   ;;  %v1071_v23 = vld [vmem:[%s3509_s4] sm:$0xff] (!%p316_p3) }
   0x8   : > { %2621 = vmatpush3.bf16.msra.mxu0 (!%p316_p3), %v2973_v0  ;;  %417 = vst.msk [vmem:[#allocation2 + $0x8] sm:$0xff] (!%p316_p3), %vm415_vm0, %v3051_v3  ;;  %419 = vst.msk [vmem:[#allocation2 + $0x18] sm:$0xff] (!%p316_p3), %vm415_vm0, %v3051_v3  ;;  %v1072_v24 = vld [vmem:[%s3509_s4 + $0x8] sm:$0xff] (!%p316_p3)  ;;  %v1073_v26 = vld [vmem:[%s3509_s4 + $0x10] sm:$0xff] (!%p316_p3)  ;;  %s2373_s10 = sshll.u32 (!%p316_p3), %s3041_s27, 2  ;;  %s3052_s20 = smov (!%p316_p3), 64  }
   0x9   : > { %2622 = vmatprep.subr.bf16.mxu0 (!%p316_p3), %v2974_v1  ;;  %420 = vst.msk [vmem:[#allocation2 + $0x20] sm:$0xff] (!%p316_p3), %vm415_vm0, %v3051_v3  ;;  %421 = vst.msk [vmem:[#allocation2 + $0x28] sm:$0xff] (!%p316_p3), %vm415_vm0, %v3051_v3  ;;  %v2832_v25 = vpack.c.bf16 (!%p316_p3), %v1072_v24, %v1071_v23  ;;  %v1074_v27 = vld [vmem:[%s3509_s4 + $0x18] sm:$0xff] (!%p316_p3)  ;;  %v1075_v29 = vld [vmem:[%s3509_s4 + $0x20] sm:$0xff] (!%p316_p3)  ;;  %p387_p5 = scmp.lt.s32.totalorder (!%p316_p3), %s2373_s10, 7  ;;  %s3053_s24 = smov (!%p316_p3), 32  }
   0xa   : > { %422 = vst.msk [vmem:[#allocation2 + $0x30] sm:$0xff] (!%p316_p3), %vm415_vm0, %v3051_v3  ;;  %423 = vst.msk [vmem:[#allocation2 + $0x38] sm:$0xff] (!%p316_p3), %vm415_vm0, %v3051_v3  ;;  %v2836_v28 = vpack.c.bf16 (!%p316_p3), %v1074_v27, %v1073_v26  ;;  %v2430_v30 = vld [vmem:[%s3509_s4 + $0x28] sm:$0xff] (!%p316_p3)  ;;  %v2431_v31 = vld [vmem:[%s3509_s4 + $0x30] sm:$0xff] (!%p316_p3)  ;;  %s3054_s25 = smov (!%p316_p3), 96   ;;  %vm2197_vm2 = vcmask (!%p316_p3), 261120  }
   0xb   : > { %424 = vst.msk [vmem:[#allocation2 + $0x40] sm:$0xff] (!%p316_p3), %vm415_vm0, %v3051_v3  ;;  %425 = vst.msk [vmem:[#allocation2 + $0x48] sm:$0xff] (!%p316_p3), %vm415_vm0, %v3051_v3  ;;  %2833 = vmatprep.subr.bf16.mxu1 (!%p316_p3), %v2832_v25  ;;  %v3237_v32 = vpack.c.bf16 (!%p316_p3), %v2431_v31, %v2430_v30  ;;  %v958_v33 = vld [vmem:[%s3510_s5] sm:$0xff] (!%p316_p3)  ;;  %v959_v34 = vld [vmem:[%s3510_s5 + $0x8] sm:$0xff] (!%p316_p3) }
   0xc   : > { %426 = vst.msk [vmem:[#allocation2 + $0x50] sm:$0xff] (!%p316_p3), %vm415_vm0, %v3051_v3  ;;  %427 = vst.msk [vmem:[#allocation2 + $0x58] sm:$0xff] (!%p316_p3), %vm415_vm0, %v3051_v3  ;;  %2623 = vmatpush3.bf16.msra.mxu0 (!%p316_p3), %v2974_v1  ;;  %2835 = vmatpush3.bf16.msra.mxu1 (!%p316_p3), %v2832_v25  ;;  %v2824_v35 = vpack.c.bf16 (!%p316_p3), %v959_v34, %v958_v33  ;;  %v960_v36 = vld [vmem:[%s3510_s5 + $0x10] sm:$0xff] (!%p316_p3)  ;;  %v961_v37 = vld [vmem:[%s3510_s5 + $0x18] sm:$0xff] (!%p316_p3) }
   0xd   : > { %428 = vst.msk [vmem:[#allocation2 + $0x60] sm:$0xff] (!%p316_p3), %vm415_vm0, %v3051_v3  ;;  %429 = vst.msk [vmem:[#allocation2 + $0x68] sm:$0xff] (!%p316_p3), %vm415_vm0, %v3051_v3  ;;  %2624 = vmatprep.subr.bf16.mxu0 (!%p316_p3), %v2975_v2  ;;  %2837 = vmatprep.subr.bf16.mxu1 (!%p316_p3), %v2836_v28  ;;  %v2828_v38 = vpack.c.bf16 (!%p316_p3), %v961_v37, %v960_v36  ;;  %v962_v39 = vld [vmem:[%s3510_s5 + $0x20] sm:$0xff] (!%p316_p3)  ;;  %v2432_v63 = vld [vmem:[%s3509_s4 + $0x38] sm:$0xff] (!%p316_p3) }
   0xe   : > { %s3128_s13 = scalar_select %p372_p4, %s3041_s27, 1  ;;  %430 = vst.msk [vmem:[#allocation2 + $0x70] sm:$0xff] %vm415_vm0, %v3051_v3  ;;  %431 = vst.msk [vmem:[#allocation2 + $0x78] sm:$0xff] %vm415_vm0, %v3051_v3  ;;  %v454_v44 = vld [vmem:[#allocation2 + $0x10] sm:$0xff]  ;;  %v452_v45 = vld [vmem:[#allocation2] sm:$0xff] }
   0xf   : > { %432 = vst.msk [vmem:[#allocation2 + $0x80] sm:$0xff] %vm415_vm0, %v3051_v3  ;;  %433 = vst.msk [vmem:[#allocation2 + $0x88] sm:$0xff] %vm415_vm0, %v3051_v3  ;;  %s3519_s10 = smov (!%p387_p5, %s2373_s10), 7  ;;  %v455_v47 = vld [vmem:[#allocation2 + $0x18] sm:$0xff]  ;;  %v453_v50 = vld [vmem:[#allocation2 + $0x8] sm:$0xff] }
  0x10   : > { %s2944_s16 = smul.u32 144, %s3128_s13  ;;  %434 = vst.msk [vmem:[#allocation2 + $0x90] sm:$0xff] %vm415_vm0, %v3051_v3  ;;  %435 = vst.msk [vmem:[#allocation2 + $0x98] sm:$0xff] %vm415_vm0, %v3051_v3  ;;  %2625 = vmatpush3.bf16.msra.mxu0 %v2975_v2  ;;  %2839 = vmatpush3.bf16.msra.mxu1 %v2836_v28  ;;  %s3256_s11 = sshll.u32 %s3519_s10, 3  ;;  %v456_v57 = vld [vmem:[#allocation2 + $0x20] sm:$0xff]  ;;  %v457_v62 = vld [vmem:[#allocation2 + $0x28] sm:$0xff] }
  0x11   : > { %436 = vst.msk [vmem:[#allocation2 + $0xa0] sm:$0xff] %vm415_vm0, %v3051_v3  ;;  %437 = vst.msk [vmem:[#allocation2 + $0xa8] sm:$0xff] %vm415_vm0, %v3051_v3  ;;  %2626 = vmatprep.subr.bf16.mxu0 %v2976_v5  ;;  %2688 = vmatprep.subr.mxu1 %v1075_v29  ;;  %s390_s14 = scalar_lea.vmem %s3507_s2, %s3256_s11  ;;  %v458_v56 = vld [vmem:[#allocation2 + $0x30] sm:$0xff]  ;;  %v459_v59 = vld [vmem:[#allocation2 + $0x38] sm:$0xff]  ;;  %s396_s23 = scalar_lea.vmem %s3508_s3, %s3256_s11 }
  0x12   : > { %438 = vst.msk [vmem:[#allocation2 + $0xb0] sm:$0xff] %vm415_vm0, %v3051_v3  ;;  %439 = vst.msk [vmem:[#allocation2 + $0xb8] sm:$0xff] %vm415_vm0, %v3051_v3  ;;  %s3175_s19 = scalar_lea.vmem %s3505_s0, %s2944_s16  ;;  %v954_v40 = vld [vmem:[%s390_s14] sm:$0xff]  ;;  %v955_v41 = vld [vmem:[%s390_s14 + $0x8] sm:$0xff]  ;;  %s408_s10 = scalar_lea.vmem %s3513_s8, %s3256_s11 }
  0x13   : > { %440 = vst.msk [vmem:[#allocation2 + $0xc0] sm:$0xff] %vm415_vm0, %v3051_v3  ;;  %441 = vst.msk [vmem:[#allocation2 + $0xc8] sm:$0xff] %vm415_vm0, %v3051_v3  ;;  %v2977_v4 = vld [vmem:[%s3175_s19] sm:$0xff]   ;;  %v2978_v6 = vld [vmem:[%s3175_s19 + $0x8] sm:$0xff]  }
  0x14   : > { %442 = vst.msk [vmem:[#allocation2 + $0xd0] sm:$0xff] %vm415_vm0, %v3051_v3  ;;  %443 = vst.msk [vmem:[#allocation2 + $0xd8] sm:$0xff] %vm415_vm0, %v3051_v3  ;;  %2628 = vmatprep.mubr.msk.bf16.mxu0 %vm646_vm1, %v2977_v4  ;;  %2627 = vmatpush3.bf16.msra.mxu0 %v2976_v5  ;;  %v2979_v7 = vld [vmem:[%s3175_s19 + $0x10] sm:$0xff]   ;;  %v2980_v8 = vld [vmem:[%s3175_s19 + $0x18] sm:$0xff]  }
  0x15   : > { %444 = vst.msk [vmem:[#allocation2 + $0xe0] sm:$0xff] %vm415_vm0, %v3051_v3  ;;  %445 = vst.msk [vmem:[#allocation2 + $0xe8] sm:$0xff] %vm415_vm0, %v3051_v3  ;;  %v2981_v9 = vld [vmem:[%s3175_s19 + $0x20] sm:$0xff]   ;;  %v2982_v10 = vld [vmem:[%s3175_s19 + $0x28] sm:$0xff]   ;;  %2689 = vmatpush3.msra.mxu1 %v1075_v29  ;;  %2825 = vmatprep.subr.bf16.mxu0 %v2824_v35 }
  0x16   : > { %446 = vst.msk [vmem:[#allocation2 + $0xf0] sm:$0xff] %vm415_vm0, %v3051_v3  ;;  %447 = vst.msk [vmem:[#allocation2 + $0xf8] sm:$0xff] %vm415_vm0, %v3051_v3  ;;  %v2983_v11 = vld [vmem:[%s3175_s19 + $0x30] sm:$0xff]   ;;  %v2984_v12 = vld [vmem:[%s3175_s19 + $0x38] sm:$0xff]   ;;  %2841 = vmatprep.subr.bf16.mxu1 %v3237_v32 }
  0x17   : > { %448 = vst.msk [vmem:[#allocation2 + $0x100] sm:$0xff] %vm415_vm0, %v3051_v3  ;;  %449 = vst.msk [vmem:[#allocation2 + $0x108] sm:$0xff] %vm415_vm0, %v3051_v3  ;;  %2629 = vmatmul.mubr.msk.bf16.vlgmr.msra.gmra.mrb[0].mxu0 %vm646_vm1, %v2978_v6  ;;  %v2985_v13 = vld [vmem:[%s3175_s19 + $0x40] sm:$0xff]   ;;  %v2986_v14 = vld [vmem:[%s3175_s19 + $0x48] sm:$0xff]  }
  0x18   : > { %450 = vst.msk [vmem:[#allocation2 + $0x110] sm:$0xff] %vm415_vm0, %v3051_v3  ;;  %451 = vst.msk [vmem:[#allocation2 + $0x118] sm:$0xff] %vm415_vm0, %v3051_v3  ;;  %2632 = vmatprep.mubr.msk.bf16.mxu0 %vm646_vm1, %v2979_v7  ;;  %v2987_v15 = vld [vmem:[%s3175_s19 + $0x50] sm:$0xff]   ;;  %v2988_v16 = vld [vmem:[%s3175_s19 + $0x58] sm:$0xff]   ;;  %2827 = vmatpush3.bf16.msra.mxu0 %v2824_v35 }
  0x19   : > { %v2989_v17 = vld [vmem:[%s3175_s19 + $0x60] sm:$0xff]   ;;  %v2990_v18 = vld [vmem:[%s3175_s19 + $0x68] sm:$0xff]   ;;  %v2991_v19 = vld [vmem:[%s3175_s19 + $0x70] sm:$0xff]   ;;  %2829 = vmatprep.subr.bf16.mxu0 %v2828_v38 }
  0x1a   : > { %v2992_v20 = vld [vmem:[%s3175_s19 + $0x78] sm:$0xff]   ;;  %v2993_v21 = vld [vmem:[%s3175_s19 + $0x80] sm:$0xff]   ;;  %v2994_v22 = vld [vmem:[%s3175_s19 + $0x88] sm:$0xff]  }
  0x1b   : > { %v956_v42 = vld [vmem:[%s390_s14 + $0x10] sm:$0xff]  ;;  %v957_v43 = vld [vmem:[%s390_s14 + $0x18] sm:$0xff]  ;;  %v2433_v0 = vld [vmem:[%s3509_s4 + $0x40] sm:$0xff]  ;;  %s402_s14 = scalar_lea.vmem %s3512_s7, %s3256_s11 }
  0x1c   : > { %2831 = vmatpush3.bf16.msra.mxu0 %v2828_v38  ;;  %v2844_v7 = vpack.c.bf16 %v2433_v0, %v2432_v63  ;;  %v2441_v26 = vld [vmem:[%s3509_s4 + $0x60] sm:$0xff]  ;;  %v2442_v27 = vld [vmem:[%s3509_s4 + $0x68] sm:$0xff]  ;;  %v466_v31 = vld [vmem:[#allocation2 + $0x70] sm:$0xff] }
  0x1d   : > { %2672 = vmatprep.subr.mxu0 %v962_v39  ;;  %v464_v33 = vld [vmem:[#allocation2 + $0x60] sm:$0xff]  ;;  %v467_v36 = vld [vmem:[#allocation2 + $0x78] sm:$0xff] }
  0x1f   : > { %2633 = vmatmul.mubr.msk.bf16.gmra.mrb[4].mxu0 %vm646_vm1, %v2980_v8 }
  0x20   : > { %2636 = vmatprep.mubr.msk.bf16.mxu0 %vm646_vm1, %v2981_v9  ;;  %2673 = vmatpush3.msra.mxu0 %v962_v39  ;;  %v465_v39 = vld [vmem:[#allocation2 + $0x68] sm:$0xff] }
  0x27   : > { %2637 = vmatmul.mubr.msk.bf16.gmra.mrb[8].mxu0 %vm646_vm1, %v2982_v10  ;;  %v462_v10 = vld [vmem:[#allocation2 + $0x50] sm:$0xff] }
  0x28   : > { %2640 = vmatprep.mubr.msk.bf16.mxu0 %vm646_vm1, %v2983_v11  ;;  %v460_v11 = vld [vmem:[#allocation2 + $0x40] sm:$0xff] }
  0x2f   : > { %2641 = vmatmul.mubr.msk.bf16.gmra.mrb[12].mxu0 %vm646_vm1, %v2984_v12 }
  0x30   : > { %2644 = vmatprep.mubr.msk.bf16.mxu0 %vm646_vm1, %v2985_v13  ;;  %v463_v13 = vld [vmem:[#allocation2 + $0x58] sm:$0xff] }
  0x37   : > { %2645 = vmatmul.mubr.msk.bf16.gmra.mrb[16].mxu0 %vm646_vm1, %v2986_v14  ;;  %v461_v14 = vld [vmem:[#allocation2 + $0x48] sm:$0xff] }
  0x38   : > { %2648 = vmatprep.mubr.msk.bf16.mxu0 %vm646_vm1, %v2987_v15  ;;  %v2434_v15 = vld [vmem:[%s3509_s4 + $0x48] sm:$0xff] }
  0x3f   : > { %2649 = vmatmul.mubr.msk.bf16.gmra.mrb[20].mxu0 %vm646_vm1, %v2988_v16 }
  0x40   : > { %2652 = vmatprep.mubr.msk.bf16.mxu0 %vm646_vm1, %v2989_v17 }
  0x47   : > { %2653 = vmatmul.mubr.msk.bf16.gmra.mrb[24].mxu0 %vm646_vm1, %v2990_v18 }
  0x48   : > { %2656 = vmatprep.mubr.msk.bf16.mxu0 %vm646_vm1, %v2991_v19  ;;  %v2439_v19 = vld [vmem:[%s3509_s4 + $0x50] sm:$0xff] }
  0x4f   : > { %2657 = vmatmul.mubr.msk.bf16.gmra.mrb[28].mxu0 %vm646_vm1, %v2992_v20  ;;  %v2440_v20 = vld [vmem:[%s3509_s4 + $0x58] sm:$0xff] }
  0x50   : > { %2660 = vmatprep.mubr.msk.bf16.mxu0 %vm646_vm1, %v2993_v21  ;;  %v2848_v29 = vpack.c.bf16 %v2440_v20, %v2439_v19 }
  0x57   : > { %2661 = vmatmul.mubr.msk.bf16.gmra.mrb[32].mxu0 %vm646_vm1, %v2994_v22 }
  0x58   : > { %2674 = vmatprep.mubr.msk.f32.mxu0 %vm415_vm0, %v954_v40 }
  0x5f   : > { %2675 = vmatmul.mubr.msk.f32.vlgmr.msra.gmra.mrb[36].mxu0 %vm415_vm0, %v955_v41 }
  0x60   : > { %2677 = vmatprep.mubr.msk.f32.mxu0 %vm415_vm0, %v956_v42  ;;  %v2443_v42 = vld [vmem:[%s3509_s4 + $0x70] sm:$0xff] }
  0x63   : > { %2678 = vmatmul.mubr.msk.f32.gmra.mrb[38].mxu0 %vm415_vm0, %v957_v43  ;;  %v2448_v43 = vld [vmem:[%s3509_s4 + $0x78] sm:$0xff] }
  0xea   : > { %v2630_v46 = vpop.f32.mrb[0].mxu0 }
  0xeb   : > { %v880_v48 = vadd.f32 %v2630_v46, %v454_v44  ;;  %v735_v49 = vpop.f32.mrb[1].mxu0 }
  0xec   : > { %v878_v51 = vadd.f32 %v735_v49, %v452_v45  ;;  %v2631_v52 = vpop.f32.mrb[2].mxu0 }
  0xed   : > { %917 = vst.msk [vmem:[#allocation2 + $0x10] sm:$0xff] %vm415_vm0, %v880_v48  ;;  %v881_v53 = vadd.f32 %v2631_v52, %v455_v47  ;;  %v738_v54 = vpop.f32.mrb[3].mxu0  ;;  %v2449_v48 = vld [vmem:[%s3509_s4 + $0x80] sm:$0xff] }
  0xee   : > { %915 = vst.msk [vmem:[#allocation2] sm:$0xff] %vm415_vm0, %v878_v51  ;;  %v879_v55 = vadd.f32 %v738_v54, %v453_v50  ;;  %v2450_v50 = vld [vmem:[%s3509_s4 + $0x88] sm:$0xff]  ;;  %v2451_v51 = vld [vmem:[%s3509_s4 + $0x90] sm:$0xff]  ;;  %v2856_v52 = vpack.c.bf16 %v2449_v48, %v2448_v43  ;;  %v468_v54 = vld [vmem:[#allocation2 + $0x80] sm:$0xff] }
  0xef   : > { %918 = vst.msk [vmem:[#allocation2 + $0x18] sm:$0xff] %vm415_vm0, %v881_v53  ;;  %v470_v53 = vld [vmem:[#allocation2 + $0x90] sm:$0xff] }
  0xf0   : > { %916 = vst.msk [vmem:[#allocation2 + $0x8] sm:$0xff] %vm415_vm0, %v879_v55 }
  0xf2   : > { %v2634_v58 = vpop.f32.mrb[4].mxu0 }
  0xf3   : > { %v884_v60 = vadd.f32 %v2634_v58, %v458_v56  ;;  %v751_v61 = vpop.f32.mrb[5].mxu0  ;;  %v2860_v56 = vpack.c.bf16 %v2451_v51, %v2450_v50  ;;  %v482_v50 = vld [vmem:[#allocation2 + $0xf0] sm:$0xff]  ;;  %v2470_v51 = vld [vmem:[%s3509_s4 + $0xe8] sm:$0xff] }
  0xf4   : > { %v882_v1 = vadd.f32 %v751_v61, %v456_v57  ;;  %v2635_v2 = vpop.f32.mrb[6].mxu0  ;;  %v1069_v9 = vld [vmem:[#allocation2 + $0x10] sm:$0xff]  ;;  %v471_v57 = vld [vmem:[#allocation2 + $0x98] sm:$0xff]  ;;  %v469_v61 = vld [vmem:[#allocation2 + $0x88] sm:$0xff] }
  0xf5   : > { %921 = vst.msk [vmem:[#allocation2 + $0x30] sm:$0xff] %vm415_vm0, %v884_v60  ;;  %v885_v3 = vadd.f32 %v2635_v2, %v459_v59  ;;  %v754_v4 = vpop.f32.mrb[7].mxu0  ;;  %v1067_v5 = vld [vmem:[#allocation2] sm:$0xff] }
  0xf6   : > { %919 = vst.msk [vmem:[#allocation2 + $0x20] sm:$0xff] %vm415_vm0, %v882_v1  ;;  %v883_v6 = vadd.f32 %v754_v4, %v457_v62  ;;  %2690 = vmatprep.mubr.msk.f32.mxu1 %vm415_vm0, %v1067_v5  ;;  %v1070_v18 = vld [vmem:[#allocation2 + $0x18] sm:$0xff] }
  0xf7   : > { %922 = vst.msk [vmem:[#allocation2 + $0x38] sm:$0xff] %vm415_vm0, %v885_v3  ;;  %v1068_v8 = vld [vmem:[#allocation2 + $0x8] sm:$0xff]  ;;  %v2452_v4 = vld [vmem:[%s3509_s4 + $0x98] sm:$0xff] }
  0xf8   : > { %920 = vst.msk [vmem:[#allocation2 + $0x28] sm:$0xff] %vm415_vm0, %v883_v6  ;;  %2691 = vmatmul.mubr.msk.f32.vlgmr.msra.gmra.mrb[0].mxu1 %vm415_vm0, %v1068_v8  ;;  %v2458_v8 = vld [vmem:[%s3509_s4 + $0xa8] sm:$0xff] }
  0xf9   : > { %2843 = vmatpush3.bf16.msra.mxu1 %v3237_v32  ;;  %2693 = vmatprep.mubr.msk.f32.mxu1 %vm415_vm0, %v1069_v9  ;;  %v2852_v32 = vpack.c.bf16 %v2442_v27, %v2441_v26  ;;  %v474_v9 = vld [vmem:[#allocation2 + $0xb0] sm:$0xff]  ;;  %v2461_v27 = vld [vmem:[%s3509_s4 + $0xc0] sm:$0xff] }
  0xfa   : > { %v2638_v12 = vpop.f32.mrb[8].mxu0  ;;  %2845 = vmatprep.subr.bf16.mxu1 %v2844_v7 }
  0xfb   : > { %v888_v16 = vadd.f32 %v2638_v12, %v462_v10  ;;  %v767_v17 = vpop.f32.mrb[9].mxu0  ;;  %v2459_v10 = vld [vmem:[%s3509_s4 + $0xb0] sm:$0xff]  ;;  %v472_v12 = vld [vmem:[#allocation2 + $0xa0] sm:$0xff] }
  0xfc   : > { %v886_v21 = vadd.f32 %v767_v17, %v460_v11  ;;  %2694 = vmatmul.mubr.msk.f32.gmra.mrb[2].mxu1 %vm415_vm0, %v1070_v18  ;;  %v2639_v22 = vpop.f32.mrb[10].mxu0  ;;  %v1179_v34 = vld [vmem:[#allocation2 + $0x30] sm:$0xff]  ;;  %v2460_v11 = vld [vmem:[%s3509_s4 + $0xb8] sm:$0xff]  ;;  %v473_v18 = vld [vmem:[#allocation2 + $0xa8] sm:$0xff] }
  0xfd   : > { %925 = vst.msk [vmem:[#allocation2 + $0x50] sm:$0xff] %vm415_vm0, %v888_v16  ;;  %2847 = vmatpush3.bf16.msra.mxu1 %v2844_v7  ;;  %v889_v23 = vadd.f32 %v2639_v22, %v463_v13  ;;  %v770_v24 = vpop.f32.mrb[11].mxu0  ;;  %v1177_v25 = vld [vmem:[#allocation2 + $0x20] sm:$0xff]  ;;  %v2868_v19 = vpack.c.bf16 %v2460_v11, %v2459_v10 }
  0xfe   : > { %923 = vst.msk [vmem:[#allocation2 + $0x40] sm:$0xff] %vm415_vm0, %v886_v21  ;;  %v887_v28 = vadd.f32 %v770_v24, %v461_v14  ;;  %2704 = vmatprep.subr.mxu1 %v2434_v15  ;;  %2706 = vmatprep.mubr.msk.f32.mxu1 %vm415_vm0, %v1177_v25  ;;  %v1180_v44 = vld [vmem:[#allocation2 + $0x38] sm:$0xff]  ;;  %v2457_v7 = vld [vmem:[%s3509_s4 + $0xa0] sm:$0xff] }
  0xff   : > { %926 = vst.msk [vmem:[#allocation2 + $0x58] sm:$0xff] %vm415_vm0, %v889_v23  ;;  %v1178_v30 = vld [vmem:[#allocation2 + $0x28] sm:$0xff]  ;;  %v2864_v13 = vpack.c.bf16 %v2458_v8, %v2457_v7  ;;  %v486_v7 = vld [vmem:[#allocation2 + $0x110] sm:$0xff] }
 0x100   : > { %924 = vst.msk [vmem:[#allocation2 + $0x48] sm:$0xff] %vm415_vm0, %v887_v28 }
 0x101   : > { %2705 = vmatpush3.msra.mxu1 %v2434_v15  ;;  %v475_v15 = vld [vmem:[#allocation2 + $0xb8] sm:$0xff] }
 0x102   : > { %2707 = vmatmul.mubr.msk.f32.vlgmr.msra.gmra.mrb[0].mxu1 %vm415_vm0, %v1178_v30  ;;  %2849 = vmatprep.subr.bf16.mxu1 %v2848_v29  ;;  %v2642_v35 = vpop.f32.mrb[12].mxu0  ;;  %v478_v30 = vld [vmem:[#allocation2 + $0xd0] sm:$0xff] }
 0x103   : > { %2709 = vmatprep.mubr.msk.f32.mxu1 %vm415_vm0, %v1179_v34  ;;  %2851 = vmatpush3.bf16.msra.mxu1 %v2848_v29  ;;  %v892_v37 = vadd.f32 %v2642_v35, %v466_v31  ;;  %v783_v38 = vpop.f32.mrb[13].mxu0  ;;  %v2466_v29 = vld [vmem:[%s3509_s4 + $0xc8] sm:$0xff]  ;;  %v479_v35 = vld [vmem:[#allocation2 + $0xd8] sm:$0xff] }
 0x104   : > { %2853 = vmatprep.subr.bf16.mxu1 %v2852_v32  ;;  %v890_v40 = vadd.f32 %v783_v38, %v464_v33  ;;  %v2643_v41 = vpop.f32.mrb[14].mxu0  ;;  %v1290_v62 = vld [vmem:[#allocation2 + $0x50] sm:$0xff]  ;;  %v476_v33 = vld [vmem:[#allocation2 + $0xc0] sm:$0xff] }
 0x105   : > { %929 = vst.msk [vmem:[#allocation2 + $0x70] sm:$0xff] %vm415_vm0, %v892_v37  ;;  %v893_v45 = vadd.f32 %v2643_v41, %v467_v36  ;;  %v786_v46 = vpop.f32.mrb[15].mxu0  ;;  %v1288_v47 = vld [vmem:[#allocation2 + $0x40] sm:$0xff]  ;;  %v2468_v37 = vld [vmem:[%s3509_s4 + $0xd8] sm:$0xff] }
 0x106   : > { %2710 = vmatmul.mubr.msk.f32.gmra.mrb[2].mxu1 %vm415_vm0, %v1180_v44  ;;  %927 = vst.msk [vmem:[#allocation2 + $0x60] sm:$0xff] %vm415_vm0, %v890_v40  ;;  %v891_v49 = vadd.f32 %v786_v46, %v465_v39  ;;  %v1291_v6 = vld [vmem:[#allocation2 + $0x58] sm:$0xff]  ;;  %v2469_v38 = vld [vmem:[%s3509_s4 + $0xe0] sm:$0xff]  ;;  %v477_v40 = vld [vmem:[#allocation2 + $0xc8] sm:$0xff] }
 0x107   : > { %2855 = vmatpush3.bf16.msra.mxu1 %v2852_v32  ;;  %930 = vst.msk [vmem:[#allocation2 + $0x78] sm:$0xff] %vm415_vm0, %v893_v45  ;;  %2722 = vmatprep.mubr.msk.f32.mxu1 %vm415_vm0, %v1288_v47  ;;  %v1289_v58 = vld [vmem:[#allocation2 + $0x48] sm:$0xff]  ;;  %v2467_v32 = vld [vmem:[%s3509_s4 + $0xd0] sm:$0xff]  ;;  %v2876_v46 = vpack.c.bf16 %v2469_v38, %v2468_v37  ;;  %v2496_v38 = vld [vmem:[%s3509_s4 + $0x158] sm:$0xff] }
 0x108   : > { %928 = vst.msk [vmem:[#allocation2 + $0x68] sm:$0xff] %vm415_vm0, %v891_v49  ;;  %2720 = vmatprep.subr.mxu1 %v2443_v42  ;;  %v2872_v41 = vpack.c.bf16 %v2467_v32, %v2466_v29  ;;  %v2488_v32 = vld [vmem:[%s3509_s4 + $0x138] sm:$0xff]  ;;  %v2495_v37 = vld [vmem:[%s3509_s4 + $0x150] sm:$0xff] }
 0x10a   : > { %v2646_v55 = vpop.f32.mrb[16].mxu0 }
 0x10b   : > { %2721 = vmatpush3.msra.mxu1 %v2443_v42  ;;  %v896_v59 = vadd.f32 %v2646_v55, %v470_v53  ;;  %v799_v60 = vpop.f32.mrb[17].mxu0 }
 0x10c   : > { %2723 = vmatmul.mubr.msk.f32.vlgmr.msra.gmra.mrb[0].mxu1 %vm415_vm0, %v1289_v58  ;;  %2857 = vmatprep.subr.bf16.mxu1 %v2856_v52  ;;  %v894_v63 = vadd.f32 %v799_v60, %v468_v54  ;;  %v2647_v0 = vpop.f32.mrb[18].mxu0  ;;  %v1401_v25 = vld [vmem:[#allocation2 + $0x70] sm:$0xff]  ;;  %v2476_v58 = vld [vmem:[%s3509_s4 + $0xf8] sm:$0xff] }
 0x10d   : > { %2725 = vmatprep.mubr.msk.f32.mxu1 %vm415_vm0, %v1290_v62  ;;  %2859 = vmatpush3.bf16.msra.mxu1 %v2856_v52  ;;  %933 = vst.msk [vmem:[#allocation2 + $0x90] sm:$0xff] %vm415_vm0, %v896_v59  ;;  %v897_v1 = vadd.f32 %v2647_v0, %v471_v57  ;;  %v802_v2 = vpop.f32.mrb[19].mxu0  ;;  %v1399_v5 = vld [vmem:[#allocation2 + $0x60] sm:$0xff]  ;;  %v2475_v54 = vld [vmem:[%s3509_s4 + $0xf0] sm:$0xff] }
 0x10e   : > { %2861 = vmatprep.subr.bf16.mxu1 %v2860_v56  ;;  %931 = vst.msk [vmem:[#allocation2 + $0x80] sm:$0xff] %vm415_vm0, %v894_v63  ;;  %v895_v3 = vadd.f32 %v802_v2, %v469_v61  ;;  %v1402_v31 = vld [vmem:[#allocation2 + $0x78] sm:$0xff]  ;;  %v480_v52 = vld [vmem:[#allocation2 + $0xe0] sm:$0xff]  ;;  %v481_v61 = vld [vmem:[#allocation2 + $0xe8] sm:$0xff] }
 0x10f   : > { %934 = vst.msk [vmem:[#allocation2 + $0x98] sm:$0xff] %vm415_vm0, %v897_v1  ;;  %v1400_v22 = vld [vmem:[#allocation2 + $0x68] sm:$0xff]  ;;  %v2477_v0 = vld [vmem:[%s3509_s4 + $0x100] sm:$0xff] }
 0x110   : > { %2726 = vmatmul.mubr.msk.f32.gmra.mrb[2].mxu1 %vm415_vm0, %v1291_v6  ;;  %932 = vst.msk [vmem:[#allocation2 + $0x88] sm:$0xff] %vm415_vm0, %v895_v3  ;;  %v2478_v1 = vld [vmem:[%s3509_s4 + $0x108] sm:$0xff] }
 0x111   : > { %2863 = vmatpush3.bf16.msra.mxu1 %v2860_v56  ;;  %2738 = vmatprep.mubr.msk.f32.mxu1 %vm415_vm0, %v1399_v5  ;;  %v483_v56 = vld [vmem:[#allocation2 + $0xf8] sm:$0xff]  ;;  %v2884_v6 = vpack.c.bf16 %v2478_v1, %v2477_v0 }
 0x112   : > { %2736 = vmatprep.subr.mxu1 %v2452_v4  ;;  %v2650_v14 = vpop.f32.mrb[20].mxu0 }
 0x113   : > { %v900_v16 = vadd.f32 %v2650_v14, %v474_v9  ;;  %v815_v17 = vpop.f32.mrb[21].mxu0  ;;  %v484_v9 = vld [vmem:[#allocation2 + $0x100] sm:$0xff] }
 0x114   : > { %v898_v20 = vadd.f32 %v815_v17, %v472_v12  ;;  %v2651_v21 = vpop.f32.mrb[22].mxu0  ;;  %v1512_v49 = vld [vmem:[#allocation2 + $0x90] sm:$0xff]  ;;  %v487_v12 = vld [vmem:[#allocation2 + $0x118] sm:$0xff] }
 0x115   : > { %2737 = vmatpush3.msra.mxu1 %v2452_v4  ;;  %937 = vst.msk [vmem:[#allocation2 + $0xb0] sm:$0xff] %vm415_vm0, %v900_v16  ;;  %v901_v23 = vadd.f32 %v2651_v21, %v475_v15  ;;  %v818_v24 = vpop.f32.mrb[23].mxu0  ;;  %v1510_v28 = vld [vmem:[#allocation2 + $0x80] sm:$0xff]  ;;  %v2880_v4 = vpack.c.bf16 %v2476_v58, %v2475_v54  ;;  %v485_v15 = vld [vmem:[#allocation2 + $0x108] sm:$0xff]  ;;  %v2479_v16 = vld [vmem:[%s3509_s4 + $0x110] sm:$0xff] }
 0x116   : > { %2739 = vmatmul.mubr.msk.f32.vlgmr.msra.gmra.mrb[0].mxu1 %vm415_vm0, %v1400_v22  ;;  %2865 = vmatprep.subr.bf16.mxu1 %v2864_v13  ;;  %935 = vst.msk [vmem:[#allocation2 + $0xa0] sm:$0xff] %vm415_vm0, %v898_v20  ;;  %v899_v26 = vadd.f32 %v818_v24, %v473_v18  ;;  %v1513_v57 = vld [vmem:[#allocation2 + $0x98] sm:$0xff]  ;;  %v2485_v22 = vld [vmem:[%s3509_s4 + $0x120] sm:$0xff] }
 0x117   : > { %2741 = vmatprep.mubr.msk.f32.mxu1 %vm415_vm0, %v1401_v25  ;;  %2867 = vmatpush3.bf16.msra.mxu1 %v2864_v13  ;;  %938 = vst.msk [vmem:[#allocation2 + $0xb8] sm:$0xff] %vm415_vm0, %v901_v23  ;;  %v1511_v48 = vld [vmem:[#allocation2 + $0x88] sm:$0xff]  ;;  %v2484_v21 = vld [vmem:[%s3509_s4 + $0x118] sm:$0xff] }
 0x118   : > { %2869 = vmatprep.subr.bf16.mxu1 %v2868_v19  ;;  %936 = vst.msk [vmem:[#allocation2 + $0xa8] sm:$0xff] %vm415_vm0, %v899_v26  ;;  %v2486_v26 = vld [vmem:[%s3509_s4 + $0x128] sm:$0xff] }
 0x11a   : > { %2742 = vmatmul.mubr.msk.f32.gmra.mrb[2].mxu1 %vm415_vm0, %v1402_v31  ;;  %v2654_v34 = vpop.f32.mrb[24].mxu0 }
 0x11b   : > { %2871 = vmatpush3.bf16.msra.mxu1 %v2868_v19  ;;  %2754 = vmatprep.mubr.msk.f32.mxu1 %vm415_vm0, %v1510_v28  ;;  %v904_v36 = vadd.f32 %v2654_v34, %v478_v30  ;;  %v831_v39 = vpop.f32.mrb[25].mxu0  ;;  %v2888_v28 = vpack.c.bf16 %v2485_v22, %v2484_v21 }
 0x11c   : > { %2752 = vmatprep.subr.mxu1 %v2461_v27  ;;  %v902_v42 = vadd.f32 %v831_v39, %v476_v33  ;;  %v2655_v43 = vpop.f32.mrb[26].mxu0  ;;  %v1623_v10 = vld [vmem:[#allocation2 + $0xb0] sm:$0xff] }
 0x11d   : > { %941 = vst.msk [vmem:[#allocation2 + $0xd0] sm:$0xff] %vm415_vm0, %v904_v36  ;;  %v905_v44 = vadd.f32 %v2655_v43, %v479_v35  ;;  %v834_v45 = vpop.f32.mrb[27].mxu0  ;;  %v1621_v53 = vld [vmem:[#allocation2 + $0xa0] sm:$0xff]  ;;  %v2494_v36 = vld [vmem:[%s3509_s4 + $0x148] sm:$0xff] }
 0x11e   : > { %939 = vst.msk [vmem:[#allocation2 + $0xc0] sm:$0xff] %vm415_vm0, %v902_v42  ;;  %v903_v47 = vadd.f32 %v834_v45, %v477_v40  ;;  %v1624_v20 = vld [vmem:[#allocation2 + $0xb8] sm:$0xff]  ;;  %v2493_v35 = vld [vmem:[%s3509_s4 + $0x140] sm:$0xff]  ;;  %v2900_v40 = vpack.c.bf16 %v2496_v38, %v2495_v37 }
 0x11f   : > { %2753 = vmatpush3.msra.mxu1 %v2461_v27  ;;  %942 = vst.msk [vmem:[#allocation2 + $0xd8] sm:$0xff] %vm415_vm0, %v905_v44  ;;  %v1622_v8 = vld [vmem:[#allocation2 + $0xa8] sm:$0xff]  ;;  %v2487_v27 = vld [vmem:[%s3509_s4 + $0x130] sm:$0xff]  ;;  %v2896_v39 = vpack.c.bf16 %v2494_v36, %v2493_v35  ;;  %v2497_v45 = vld [vmem:[%s3509_s4 + $0x160] sm:$0xff] }
 0x120   : > { %2755 = vmatmul.mubr.msk.f32.vlgmr.msra.gmra.mrb[0].mxu1 %vm415_vm0, %v1511_v48  ;;  %2873 = vmatprep.subr.bf16.mxu1 %v2872_v41  ;;  %940 = vst.msk [vmem:[#allocation2 + $0xc8] sm:$0xff] %vm415_vm0, %v903_v47  ;;  %v2892_v29 = vpack.c.bf16 %v2487_v27, %v2486_v26 }
 0x121   : > { %2757 = vmatprep.mubr.msk.f32.mxu1 %vm415_vm0, %v1512_v49  ;;  %2875 = vmatpush3.bf16.msra.mxu1 %v2872_v41 }
 0x122   : > { %2877 = vmatprep.subr.bf16.mxu1 %v2876_v46  ;;  %v2658_v55 = vpop.f32.mrb[28].mxu0 }
 0x123   : > { %v908_v59 = vadd.f32 %v2658_v55, %v482_v50  ;;  %v847_v60 = vpop.f32.mrb[29].mxu0 }
 0x124   : > { %2758 = vmatmul.mubr.msk.f32.gmra.mrb[2].mxu1 %vm415_vm0, %v1513_v57  ;;  %v906_v62 = vadd.f32 %v847_v60, %v480_v52  ;;  %v2659_v63 = vpop.f32.mrb[30].mxu0  ;;  %v1734_v31 = vld [vmem:[#allocation2 + $0xd0] sm:$0xff] }
 0x125   : > { %2879 = vmatpush3.bf16.msra.mxu1 %v2876_v46  ;;  %2770 = vmatprep.mubr.msk.f32.mxu1 %vm415_vm0, %v1621_v53  ;;  %945 = vst.msk [vmem:[#allocation2 + $0xf0] sm:$0xff] %vm415_vm0, %v908_v59  ;;  %v909_v2 = vadd.f32 %v2659_v63, %v483_v56  ;;  %v850_v3 = vpop.f32.mrb[31].mxu0  ;;  %v1732_v17 = vld [vmem:[#allocation2 + $0xc0] sm:$0xff] }
 0x126   : > { %2768 = vmatprep.subr.mxu1 %v2470_v51  ;;  %943 = vst.msk [vmem:[#allocation2 + $0xe0] sm:$0xff] %vm415_vm0, %v906_v62  ;;  %v907_v5 = vadd.f32 %v850_v3, %v481_v61  ;;  %v1735_v34 = vld [vmem:[#allocation2 + $0xd8] sm:$0xff]  ;;  %v2421_v53 = vld [vmem:[%s3511_s6] ss:$0 sm:$0xff] }
 0x127   : > { %946 = vst.msk [vmem:[#allocation2 + $0xf8] sm:$0xff] %vm415_vm0, %v909_v2  ;;  %v1733_v30 = vld [vmem:[#allocation2 + $0xc8] sm:$0xff] }
 0x128   : > { %944 = vst.msk [vmem:[#allocation2 + $0xe8] sm:$0xff] %vm415_vm0, %v907_v5  ;;  %v2093_v5 = vld [vmem:[%s396_s23] sm:$0xff] }
 0x129   : > { %2769 = vmatpush3.msra.mxu1 %v2470_v51 }
 0x12a   : > { %2771 = vmatmul.mubr.msk.f32.vlgmr.msra.gmra.mrb[0].mxu1 %vm415_vm0, %v1622_v8  ;;  %2881 = vmatprep.subr.bf16.mxu1 %v2880_v4  ;;  %v2662_v11 = vpop.f32.mrb[32].mxu0  ;;  %v2094_v8 = vld [vmem:[%s396_s23 + $0x8] sm:$0xff] }
 0x12b   : > { %2773 = vmatprep.mubr.msk.f32.mxu1 %vm415_vm0, %v1623_v10  ;;  %2883 = vmatpush3.bf16.msra.mxu1 %v2880_v4  ;;  %v912_v13 = vadd.f32 %v2662_v11, %v486_v7  ;;  %v863_v14 = vpop.f32.mrb[33].mxu0  ;;  %v2095_v7 = vld [vmem:[%s396_s23 + $0x10] sm:$0xff] }
 0x12c   : > { %2885 = vmatprep.subr.bf16.mxu1 %v2884_v6  ;;  %v910_v18 = vadd.f32 %v863_v14, %v484_v9  ;;  %v2663_v19 = vpop.f32.mrb[34].mxu0  ;;  %v1845_v42 = vld [vmem:[#allocation2 + $0xf0] sm:$0xff]  ;;  %v2096_v9 = vld [vmem:[%s396_s23 + $0x18] sm:$0xff] }
 0x12d   : > { %949 = vst.msk [vmem:[#allocation2 + $0x110] sm:$0xff] %vm415_vm0, %v912_v13  ;;  %v913_v23 = vadd.f32 %v2663_v19, %v487_v12  ;;  %v866_v24 = vpop.f32.mrb[35].mxu0  ;;  %v1843_v33 = vld [vmem:[#allocation2 + $0xe0] sm:$0xff] }
 0x12e   : > { %2774 = vmatmul.mubr.msk.f32.gmra.mrb[2].mxu1 %vm415_vm0, %v1624_v20  ;;  %947 = vst.msk [vmem:[#allocation2 + $0x100] sm:$0xff] %vm415_vm0, %v910_v18  ;;  %v911_v25 = vadd.f32 %v866_v24, %v485_v15  ;;  %v1846_v44 = vld [vmem:[#allocation2 + $0xf8] sm:$0xff] }
 0x12f   : > { %2887 = vmatpush3.bf16.msra.mxu1 %v2884_v6  ;;  %2786 = vmatprep.mubr.msk.f32.mxu1 %vm415_vm0, %v1732_v17  ;;  %950 = vst.msk [vmem:[#allocation2 + $0x118] sm:$0xff] %vm415_vm0, %v913_v23  ;;  %v1844_v41 = vld [vmem:[#allocation2 + $0xe8] sm:$0xff] }
 0x130   : > { %2784 = vmatprep.subr.mxu1 %v2479_v16  ;;  %948 = vst.msk [vmem:[#allocation2 + $0x108] sm:$0xff] %vm415_vm0, %v911_v25 }
 0x132   : > { %v2676_v49 = vpop.f32.mrb[36].mxu0 }
 0x133   : > { %2785 = vmatpush3.msra.mxu1 %v2479_v16  ;;  %v1048_v50 = vpop.f32.mrb[37].mxu0  ;;  %v1054_v54 = vadd.f32 %v2676_v49, %v2421_v53 }
 0x134   : > { %2787 = vmatmul.mubr.msk.f32.vlgmr.msra.gmra.mrb[0].mxu1 %vm415_vm0, %v1733_v30  ;;  %2889 = vmatprep.subr.bf16.mxu1 %v2888_v28  ;;  %v1956_v47 = vld [vmem:[#allocation2 + $0x110] sm:$0xff]  ;;  %v1049_v55 = vadd.f32 %v2421_v53, %v1048_v50 }
 0x135   : > { %2789 = vmatprep.mubr.msk.f32.mxu1 %vm415_vm0, %v1734_v31  ;;  %2891 = vmatpush3.bf16.msra.mxu1 %v2888_v28  ;;  %v1954_v43 = vld [vmem:[#allocation2 + $0x100] sm:$0xff] }
 0x136   : > { %2893 = vmatprep.subr.bf16.mxu1 %v2892_v29  ;;  %v1957_v48 = vld [vmem:[#allocation2 + $0x118] sm:$0xff]  ;;  %v2679_v51 = vpop.f32.mrb[38].mxu0 }
 0x137   : > { %v1955_v46 = vld [vmem:[#allocation2 + $0x108] sm:$0xff]  ;;  %v1058_v52 = vpop.f32.mrb[39].mxu0  ;;  %v1064_v59 = vadd.f32 %v2679_v51, %v2421_v53 }
 0x138   : > { %2790 = vmatmul.mubr.msk.f32.gmra.mrb[2].mxu1 %vm415_vm0, %v1735_v34  ;;  %v1059_v61 = vadd.f32 %v2421_v53, %v1058_v52 }
 0x139   : > { %2895 = vmatpush3.bf16.msra.mxu1 %v2892_v29  ;;  %2802 = vmatprep.mubr.msk.f32.mxu1 %vm415_vm0, %v1843_v33 }
 0x13a   : > { %2800 = vmatprep.subr.mxu1 %v2488_v32 }
 0x13d   : > { %2801 = vmatpush3.msra.mxu1 %v2488_v32 }
 0x13e   : > { %2803 = vmatmul.mubr.msk.f32.vlgmr.msra.gmra.mrb[0].mxu1 %vm415_vm0, %v1844_v41  ;;  %2897 = vmatprep.subr.bf16.mxu1 %v2896_v39 }
 0x13f   : > { %2805 = vmatprep.mubr.msk.f32.mxu1 %vm415_vm0, %v1845_v42  ;;  %2899 = vmatpush3.bf16.msra.mxu1 %v2896_v39 }
 0x140   : > { %2901 = vmatprep.subr.bf16.mxu1 %v2900_v40 }
 0x142   : > { %2806 = vmatmul.mubr.msk.f32.gmra.mrb[2].mxu1 %vm415_vm0, %v1846_v44 }
 0x143   : > { %2903 = vmatpush3.bf16.msra.mxu1 %v2900_v40  ;;  %2818 = vmatprep.mubr.msk.f32.mxu1 %vm415_vm0, %v1954_v43 }
 0x144   : > { %2816 = vmatprep.subr.mxu1 %v2497_v45 }
 0x147   : > { %2817 = vmatpush3.msra.mxu1 %v2497_v45 }
 0x148   : > { %2819 = vmatmul.mubr.msk.f32.vlgmr.msra.gmra.mrb[0].mxu1 %vm415_vm0, %v1955_v46 }
 0x149   : > { %2821 = vmatprep.mubr.msk.f32.mxu1 %vm415_vm0, %v1956_v47 }
 0x14c   : > { %2822 = vmatmul.mubr.msk.f32.gmra.mrb[2].mxu1 %vm415_vm0, %v1957_v48 }
 0x21b   : > { %v2820_v56 = vpop.f32.mrb[0].mxu1 }
 0x21c   : > { %v2905_v57 = vadd.f32 %v2820_v56, %v1054_v54  ;;  %v2042_v58 = vpop.f32.mrb[1].mxu1 }
 0x21d   : > { %v2907_v60 = vadd.f32 %v2042_v58, %v1049_v55 }
 0x21e   : > { %v2503_v10 = vmul.f32 -1.442695, %v2905_v57 }
 0x21f   : > { %2995 = vtanh.f32 %v2907_v60  ;;  %v2823_v62 = vpop.f32.mrb[2].mxu1  ;;  %v2502_v12 = vmul.f32 -1.442695, %v2907_v60 }
 0x220   : > { %v2909_v63 = vadd.f32 %v2823_v62, %v1064_v59  ;;  %v2052_v0 = vpop.f32.mrb[3].mxu1  ;;  %2997 = vtanh.f32 %v2905_v57 }
 0x221   : > { %v2911_v1 = vadd.f32 %v2052_v0, %v1059_v61 }
 0x222   : > { %v2505_v13 = vmul.f32 -1.442695, %v2909_v63 }
 0x223   : > { %2999 = vtanh.f32 %v2911_v1  ;;  %v2504_v11 = vmul.f32 -1.442695, %v2911_v1 }
 0x224   : > { %3001 = vtanh.f32 %v2909_v63 }
 0x225   : > { %3003 = vpow2.f32 %v2503_v10 }
 0x226   : > { %3005 = vpow2.f32 %v2504_v11 }
 0x227   : > { %3007 = vpow2.f32 %v2502_v12 }
 0x228   : > { %3009 = vpow2.f32 %v2505_v13 }
 0x229   : > { %v2996_v2 = vpop.eup %2995 }
 0x22a   : > { %2121 = vrot.lane.b32.xlu0 %v2996_v2, %s3052_s20  ;;  %v2998_v3 = vpop.eup %2997 }
 0x22d   : > { %v3000_v4 = vpop.eup %2999 }
 0x22e   : > { %2123 = vrot.lane.b32.xlu0 %v2998_v3, %s3052_s20  ;;  %2125 = vrot.lane.b32.xlu1 %v3000_v4, %s3052_s20  ;;  %v3002_v6 = vpop.eup %3001 }
 0x22f   : > { %v3004_v14 = vpop.eup %3003 }
 0x230   : > { %v3006_v15 = vpop.eup %3005  ;;  %v2078_v16 = vadd.f32 1.0, %v3004_v14 }
 0x231   : > { %v2079_v17 = vadd.f32 1.0, %v3006_v15  ;;  %v3008_v18 = vpop.eup %3007 }
 0x232   : > { %2101 = vrot.lane.b32.xlu0 %v2093_v5, %s3053_s24  ;;  %2127 = vrot.lane.b32.xlu1 %v3002_v6, %s3052_s20  ;;  %3011 = vrcp.f32 %v2078_v16  ;;  %v2077_v19 = vadd.f32 1.0, %v3008_v18  ;;  %v3010_v20 = vpop.eup %3009 }
 0x233   : > { %3013 = vrcp.f32 %v2079_v17  ;;  %v2080_v21 = vadd.f32 1.0, %v3010_v20 }
 0x234   : > { %3015 = vrcp.f32 %v2077_v19 }
 0x235   : > { %3017 = vrcp.f32 %v2080_v21 }
 0x236   : > { %2105 = vrot.lane.b32.xlu0 %v2095_v7, %s3053_s24  ;;  %2103 = vrot.lane.b32.xlu1 %v2094_v8, %s3053_s24 }
 0x23a   : > { %2107 = vrot.lane.b32.xlu0 %v2096_v9, %s3053_s24 }
 0x23c   : > { %v3012_v23 = vpop.eup %3011 }
 0x23d   : > { %v3014_v24 = vpop.eup %3013 }
 0x23e   : > { %v3016_v29 = vpop.eup %3015 }
 0x23f   : > { %v3018_v32 = vpop.eup %3017 }
 0x29c   : > { %v2122_v22 = vpop.permute.xlu0 %2121 }
 0x29d   : > { %v2133_v30 = vmul.f32 %v3016_v29, %v2122_v22 }
 0x2a0   : > { %v2124_v25 = vpop.permute.xlu0 %2123  ;;  %v2126_v26 = vpop.permute.xlu1 %2125 }
 0x2a1   : > { %v2134_v27 = vmul.f32 %v3012_v23, %v2124_v25  ;;  %v2135_v28 = vmul.f32 %v3014_v24, %v2126_v26 }
 0x2a3   : > { %2143 = vrot.lane.b32.xlu1 %v2134_v27, %s3053_s24  ;;  %2145 = vrot.lane.b32.xlu0 %v2135_v28, %s3053_s24 }
 0x2a4   : > { %v2128_v31 = vpop.permute.xlu1 %2127  ;;  %v2102_v34 = vpop.permute.xlu0 %2101 }
 0x2a5   : > { %v2136_v33 = vmul.f32 %v3018_v32, %v2128_v31  ;;  %v2113_v41 = vmul.f32 %v3016_v29, %v2102_v34 }
 0x2a7   : > { %2141 = vrot.lane.b32.xlu1 %v2133_v30, %s3053_s24 }
 0x2a8   : > { %v2106_v35 = vpop.permute.xlu0 %2105  ;;  %v2104_v36 = vpop.permute.xlu1 %2103 }
 0x2a9   : > { %v2114_v37 = vmul.f32 %v3012_v23, %v2104_v36  ;;  %v2115_v43 = vmul.f32 %v3014_v24, %v2106_v35 }
 0x2ab   : > { %2147 = vrot.lane.b32.xlu1 %v2136_v33, %s3053_s24 }
 0x2ac   : > { %v2108_v38 = vpop.permute.xlu0 %2107 }
 0x2ad   : > { %v2116_v47 = vmul.f32 %v3018_v32, %v2108_v38 }
 0x315   : > { %v2144_v39 = vpop.permute.xlu1 %2143  ;;  %v2146_v42 = vpop.permute.xlu0 %2145 }
 0x316   : > { %v2154_v40 = vadd.f32 %v2144_v39, %v2114_v37  ;;  %v2155_v46 = vadd.f32 %v2146_v42, %v2115_v43 }
 0x318   : > { %3019 = vtanh.f32 %v2154_v40 }
 0x319   : > { %v2142_v44 = vpop.permute.xlu1 %2141 }
 0x31a   : > { %v2153_v45 = vadd.f32 %v2142_v44, %v2113_v41 }
 0x31c   : > { %3021 = vtanh.f32 %v2153_v45 }
 0x31d   : > { %v2148_v48 = vpop.permute.xlu1 %2147  ;;  %3023 = vtanh.f32 %v2155_v46 }
 0x31e   : > { %v2156_v49 = vadd.f32 %v2148_v48, %v2116_v47 }
 0x320   : > { %3025 = vtanh.f32 %v2156_v49 }
 0x322   : > { %v3020_v50 = vpop.eup %3019 }
 0x323   : > { %2167 = vrot.lane.b32.xlu1 %v3020_v50, %s3052_s20 }
 0x326   : > { %v3022_v51 = vpop.eup %3021 }
 0x327   : > { %2165 = vrot.lane.b32.xlu0 %v3022_v51, %s3052_s20  ;;  %v3024_v52 = vpop.eup %3023 }
 0x32a   : > { %v3026_v53 = vpop.eup %3025 }
 0x32b   : > { %2171 = vrot.lane.b32.xlu1 %v3026_v53, %s3052_s20  ;;  %2169 = vrot.lane.b32.xlu0 %v3024_v52, %s3052_s20 }
 0x32f   : > { %2206 = vrot.lane.b32.xlu1 %v2153_v45, %s3054_s25 }
 0x333   : > { %2208 = vrot.lane.b32.xlu1 %v2154_v40, %s3054_s25 }
 0x337   : > { %2210 = vrot.lane.b32.xlu1 %v2155_v46, %s3054_s25 }
 0x33b   : > { %2212 = vrot.lane.b32.xlu1 %v2156_v49, %s3054_s25 }
 0x395   : > { %v2168_v54 = vpop.permute.xlu1 %2167 }
 0x396   : > { %v2178_v55 = vmul.f32 %v3012_v23, %v2168_v54 }
 0x398   : > { %2187 = vrot.lane.b32.xlu0 %v2178_v55, %s3053_s24 }
 0x399   : > { %v2166_v56 = vpop.permute.xlu0 %2165 }
 0x39a   : > { %v2177_v57 = vmul.f32 %v3016_v29, %v2166_v56 }
 0x39c   : > { %2185 = vrot.lane.b32.xlu0 %v2177_v57, %s3053_s24 }
 0x39d   : > { %v2172_v58 = vpop.permute.xlu1 %2171  ;;  %v2170_v59 = vpop.permute.xlu0 %2169 }
 0x39e   : > { %v2179_v60 = vmul.f32 %v3014_v24, %v2170_v59  ;;  %v2180_v62 = vmul.f32 %v3018_v32, %v2172_v58 }
 0x3a0   : > { %2189 = vrot.lane.b32.xlu0 %v2179_v60, %s3053_s24 }
 0x3a1   : > { %v2207_v61 = vpop.permute.xlu1 %2206 }
 0x3a2   : > { %2218 = vst.msk [vmem:[%s408_s10] sm:$0xff] %vm2197_vm2, %v2207_v61 }
 0x3a4   : > { %2191 = vrot.lane.b32.xlu0 %v2180_v62, %s3053_s24 }
 0x3a5   : > { %v2209_v63 = vpop.permute.xlu1 %2208 }
 0x3a6   : > { %2219 = vst.msk [vmem:[%s408_s10 + $0x8] sm:$0xff] %vm2197_vm2, %v2209_v63 }
 0x3a9   : > { %v2211_v0 = vpop.permute.xlu1 %2210 }
 0x3aa   : > { %2220 = vst.msk [vmem:[%s408_s10 + $0x10] sm:$0xff] %vm2197_vm2, %v2211_v0 }
 0x3ad   : > { %v2213_v1 = vpop.permute.xlu1 %2212 }
 0x3ae   : > { %2221 = vst.msk [vmem:[%s408_s10 + $0x18] sm:$0xff] %vm2197_vm2, %v2213_v1 }
 0x40a   : > { %v2188_v2 = vpop.permute.xlu0 %2187 }
 0x40b   : > { %2199 = vst.msk [vmem:[%s402_s14 + $0x8] sm:$0xff] %vm2197_vm2, %v2188_v2 }
 0x40e   : > { %v2186_v3 = vpop.permute.xlu0 %2185 }
 0x40f   : > { %2198 = vst.msk [vmem:[%s402_s14] sm:$0xff] %vm2197_vm2, %v2186_v3 }
 0x412   : > { %v2190_v4 = vpop.permute.xlu0 %2189 }
 0x413   : > { %2200 = vst.msk [vmem:[%s402_s14 + $0x10] sm:$0xff] %vm2197_vm2, %v2190_v4 }
 0x416   : > { %v2192_v5 = vpop.permute.xlu0 %2191 }
 0x417   : > { %2201 = vst.msk [vmem:[%s402_s14 + $0x18] sm:$0xff] %vm2197_vm2, %v2192_v5 }
 0x418 PF: > { %s19_s29 = sadd.s32 1, %s3049_s29   ;;  %s3514_s27 = smov %s3045_s28 }
 0x419   : > { %p16_p6 = scmp.ge.s32.totalorder %s19_s29, 4   ;;  %s3515_s28 = smov %s3517_s30 }
 0x41b   :  { %18 = sbr.rel (!%p16_p6) target bundleno = 2 (0x2), region = 115 }

</bundles_post_ra>
